<compile_context>
chip_gen: v7x
topology: tpu7x:2x2x1
jax: 0.10.0
libtpu: 0.0.40
codegen_flags: <defaults>
</compile_context>

<pallas_src>
from functools import partial

import numpy as np
import jax
import jax.numpy as jnp
from jax.experimental import pallas as pl
from jax.experimental.pallas import tpu as pltpu


def _round_up(x, m):
    return ((x + m - 1) // m) * m


def _rope_kernel(pos_ref, w_ref, cos_ref, sin_ref, *, n_axes, use_mxu):
    # pos_ref: (ts, 8) f32 (axis columns >= n_axes are zero)
    # w_ref:   (8, Dp) f32 (rows >= n_axes are zero), grid-invariant.
    pos = pos_ref[...]
    w = w_ref[...]
    if use_mxu:
        # Angle on the (otherwise idle) MXU: [ts, 8] x [8, Dp] f32 dot.
        angle = jnp.dot(pos, w, preferred_element_type=jnp.float32)
    else:
        # VPU broadcast FMAs (VALU slot); contraction dim is only n_axes
        # (2..4), so an MXU dot would be almost entirely zero padding and
        # this work hides under the HBM writeback on v5e/v6e anyway.
        angle = pos[:, 0:1] * w[0:1, :]
        for k in range(1, n_axes):
            angle = angle + pos[:, k:k + 1] * w[k:k + 1, :]
    cos_ref[...] = jnp.cos(angle).astype(cos_ref.dtype)
    sin_ref[...] = jnp.sin(angle).astype(sin_ref.dtype)


def _build_freq_matrix(theta, axes_dim, d_pad, n_rows):
    """W[k, j] = repeat-interleaved inverse frequency of output column j if
    column j belongs to axis k, else 0.  Shape [n_rows, d_pad], float32.
    Columns >= sum(axes_dim) / rows >= len(axes_dim) are zero padding."""
    W = np.zeros((n_rows, d_pad), dtype=np.float32)
    col = 0
    for i, d in enumerate(axes_dim):
        assert d % 2 == 0, "each axes_dim entry must be even"
        inv_freq = 1.0 / (theta ** (np.arange(0, d, 2, dtype=np.float32) / d))
        W[i, col:col + d] = np.repeat(inv_freq, 2)  # repeat_interleave(2)
        col += d
    return jnp.asarray(W)


def flux_pos_embed(ids, theta, axes_dim, *, ts=None, out_dtype=jnp.float32,
                   use_mxu_angle=False):
    """Pallas implementation of FluxPosEmbed.forward.

    ids: [S, n_axes] (any numeric dtype).
    Returns (freqs_cos, freqs_sin), each [S, sum(axes_dim)] in `out_dtype`
    (float32 by default, matching the PyTorch module; bf16 halves HBM
    writeback if the consumer accepts it).
    """
    ids = jnp.asarray(ids)
    S, n_axes = ids.shape
    assert n_axes == len(axes_dim)
    assert 1 <= n_axes <= 8, "more than 8 rotary axes not supported"
    D = int(sum(axes_dim))
    Dp = _round_up(D, 128)  # lane-pad so stores are unmasked full-width vst

    # Pad the axis dimension to one full sublane tile (8).  The extra columns
    # are zero so both the FMA loop (which ignores them) and the MXU dot
    # (which multiplies them by zero rows of W) are unaffected; the HBM read
    # cost is S*8*4 bytes, negligible next to the 2*S*Dp output writeback.
    NA = 8
    pos = ids.astype(jnp.float32)
    if n_axes < NA:
        pos = jnp.pad(pos, ((0, 0), (0, NA - n_axes)))
    W = _build_freq_matrix(theta, axes_dim, Dp, NA)

    out_itemsize = jnp.dtype(out_dtype).itemsize
    # Sublane packing multiple: 8 for 32-bit, 16 for bf16, 32 for 8-bit, so
    # sub-32-bit output tiles stay unmasked / un-relaid.
    sub = 8 * max(1, 4 // out_itemsize)

    # --- VMEM accounting (per pipelined buffer, 2 buffers each) ---------
    #   pos block (ts, 8) f32   -> lane-pads to (ts, 128): ts*128*4 B
    #   cos / sin blocks        -> ts*Dp*out_itemsize B each
    #   W block (8, Dp) f32     -> 8*Dp*4 B (grid-invariant, tiny)
    # Keep the total under a conservative 24 MiB budget so it fits every
    # generation's physical VMEM (v7x: 64 MiB) with ample headroom.
    budget = 24 << 20
    per_row = 2 * (128 * 4) + 4 * Dp * out_itemsize
    ts_budget = max(sub, (budget // per_row) // sub * sub)

    # Row-tile selection: big tiles (cap 4096) to amortize the ~0.35 us
    # per-grid-step overhead, but keep >= 2 grid steps when S allows so the
    # "parallel" grid axis feeds both v7x TensorCores.
    if ts is None:
        ts = min(4096, _round_up(pl.cdiv(S, 2), sub))
    ts = max(sub, min(_round_up(int(ts), sub), 4096, ts_budget, _round_up(S, sub)))
    grid = (pl.cdiv(S, ts),)

    total_vmem = (2 * ts * 128 * 4            # pos buffers (lane-padded)
                  + 4 * ts * Dp * out_itemsize  # cos + sin buffers
                  + 2 * 8 * Dp * 4)             # W buffers
    vmem_limit = int(min(max(total_vmem + (8 << 20), 16 << 20), 40 << 20))

    kernel = partial(_rope_kernel, n_axes=n_axes, use_mxu=bool(use_mxu_angle))

    out_shape = (
        jax.ShapeDtypeStruct((S, Dp), out_dtype),
        jax.ShapeDtypeStruct((S, Dp), out_dtype),
    )
    cos, sin = pl.pallas_call(
        kernel,
        out_shape=out_shape,
        grid_spec=pltpu.PrefetchScalarGridSpec(
            num_scalar_prefetch=0,
            grid=grid,
            in_specs=[
                pl.BlockSpec((ts, NA), lambda i: (i, 0)),   # pos row tile
                pl.BlockSpec((NA, Dp), lambda i: (0, 0)),   # full W, resident
            ],
            out_specs=[
                pl.BlockSpec((ts, Dp), lambda i: (i, 0)),
                pl.BlockSpec((ts, Dp), lambda i: (i, 0)),
            ],
        ),
        compiler_params=pltpu.CompilerParams(
            dimension_semantics=("parallel",),
            vmem_limit_bytes=vmem_limit,
        ),
    )(pos, W)

    if Dp != D:  # rare non-128-multiple config; real Flux has D == 128
        cos = cos[:, :D]
        sin = sin[:, :D]
    return cos, sin


def _reference(ids, theta, axes_dim):
    """Pure-numpy replica of the PyTorch forward, for verification."""
    pos = np.asarray(ids, dtype=np.float32)
    cos_out, sin_out = [], []
    for i, d in enumerate(axes_dim):
        inv_freq = 1.0 / (theta ** (np.arange(0, d, 2, dtype=np.float32) / d))
        freqs = np.outer(pos[:, i], inv_freq)               # [S, d/2]
        cos = np.repeat(np.cos(freqs), 2, axis=1)           # repeat_interleave
        sin = np.repeat(np.sin(freqs), 2, axis=1)
        cos_out.append(cos)
        sin_out.append(sin)
    return np.concatenate(cos_out, -1), np.concatenate(sin_out, -1)


if __name__ == "__main__":
    # Flux-style config (small): theta=10000, axes_dim sums to 128 (lane-aligned).
    theta = 10000
    axes_dim = (16, 56, 56)
    # S deliberately NOT a multiple of the tile: exercises the masked tail
    # block and still yields a 2-step parallel grid (auto ts = 104 -> grid 2).
    S = 200

    key = jax.random.PRNGKey(0)
    # Integer position ids, shape [S, n_axes] — same layout as Flux img/txt ids.
    ids = jax.random.randint(key, (S, len(axes_dim)), 0, 64, dtype=jnp.int32)

    ref_cos, ref_sin = _reference(np.asarray(ids), theta, axes_dim)

    # 1) Default path: f32 outputs, VPU broadcast-FMA angle.
    cos, sin = flux_pos_embed(ids, theta, axes_dim)
    cos, sin = jax.block_until_ready((cos, sin))
    np.testing.assert_allclose(np.asarray(cos), ref_cos, rtol=1e-5, atol=1e-5)
    np.testing.assert_allclose(np.asarray(sin), ref_sin, rtol=1e-5, atol=1e-5)

    # 2) MXU angle path (v7x offload option) — same numerics.
    cos_m, sin_m = flux_pos_embed(ids, theta, axes_dim, use_mxu_angle=True)
    cos_m, sin_m = jax.block_until_ready((cos_m, sin_m))
    np.testing.assert_allclose(np.asarray(cos_m), ref_cos, rtol=1e-5, atol=1e-5)
    np.testing.assert_allclose(np.asarray(sin_m), ref_sin, rtol=1e-5, atol=1e-5)

    # 3) bf16 output path (halves HBM writeback); looser tolerance for the cast.
    cos_b, sin_b = flux_pos_embed(ids, theta, axes_dim, out_dtype=jnp.bfloat16)
    cos_b, sin_b = jax.block_until_ready((cos_b, sin_b))
    np.testing.assert_allclose(np.asarray(cos_b, dtype=np.float32), ref_cos,
                               rtol=0, atol=8e-3)
    np.testing.assert_allclose(np.asarray(sin_b, dtype=np.float32), ref_sin,
                               rtol=0, atol=8e-3)

    print("KERNEL_OK")
</pallas_src>

<mosaic_0001>
module attributes {stable_mosaic.version = 11 : i64} {
  func.func @_rope_kernel(%arg0: i32, %arg1: memref<104x8xf32, #tpu.memory_space<vmem>>, %arg2: memref<8x128xf32, #tpu.memory_space<vmem>>, %arg3: memref<104x128xf32, #tpu.memory_space<vmem>>, %arg4: memref<104x128xf32, #tpu.memory_space<vmem>>) attributes {dimension_semantics = [#tpu.dimension_semantics<parallel>], iteration_bounds = array<i64: 2>, scalar_prefetch = 0 : i64, scratch_operands = 0 : i64, tpu.core_type = #tpu.core_type<tc>, window_params = [{transform_indices = @transform_0, window_bounds = array<i64: 104, 8>}, {pipeline_mode = #tpu.pipeline_mode<synchronous>, transform_indices = @transform_1, window_bounds = array<i64: 8, 128>}, {transform_indices = @transform_2, window_bounds = array<i64: 104, 128>}, {transform_indices = @transform_3, window_bounds = array<i64: 104, 128>}]} {
    %c0 = arith.constant 0 : index
    %c0_0 = arith.constant 0 : index
    %0 = vector.load %arg1[%c0, %c0_0] : memref<104x8xf32, #tpu.memory_space<vmem>>, vector<104x8xf32>
    %c0_1 = arith.constant 0 : index
    %c0_2 = arith.constant 0 : index
    %1 = vector.load %arg2[%c0_1, %c0_2] : memref<8x128xf32, #tpu.memory_space<vmem>>, vector<8x128xf32>
    %2 = vector.extract_strided_slice %0 {offsets = [0, 0], sizes = [104, 1], strides = [1, 1]} : vector<104x8xf32> to vector<104x1xf32>
    %3 = vector.extract_strided_slice %1 {offsets = [0, 0], sizes = [1, 128], strides = [1, 1]} : vector<8x128xf32> to vector<1x128xf32>
    %4 = vector.broadcast %2 : vector<104x1xf32> to vector<104x128xf32>
    %5 = vector.broadcast %3 : vector<1x128xf32> to vector<104x128xf32>
    %6 = arith.mulf %4, %5 : vector<104x128xf32>
    %7 = vector.extract_strided_slice %0 {offsets = [0, 1], sizes = [104, 1], strides = [1, 1]} : vector<104x8xf32> to vector<104x1xf32>
    %8 = vector.extract_strided_slice %1 {offsets = [1, 0], sizes = [1, 128], strides = [1, 1]} : vector<8x128xf32> to vector<1x128xf32>
    %9 = vector.broadcast %7 : vector<104x1xf32> to vector<104x128xf32>
    %10 = vector.broadcast %8 : vector<1x128xf32> to vector<104x128xf32>
    %11 = arith.mulf %9, %10 : vector<104x128xf32>
    %12 = arith.addf %6, %11 : vector<104x128xf32>
    %13 = vector.extract_strided_slice %0 {offsets = [0, 2], sizes = [104, 1], strides = [1, 1]} : vector<104x8xf32> to vector<104x1xf32>
    %14 = vector.extract_strided_slice %1 {offsets = [2, 0], sizes = [1, 128], strides = [1, 1]} : vector<8x128xf32> to vector<1x128xf32>
    %15 = vector.broadcast %13 : vector<104x1xf32> to vector<104x128xf32>
    %16 = vector.broadcast %14 : vector<1x128xf32> to vector<104x128xf32>
    %17 = arith.mulf %15, %16 : vector<104x128xf32>
    %18 = arith.addf %12, %17 : vector<104x128xf32>
    %19 = math.cos %18 : vector<104x128xf32>
    %c0_3 = arith.constant 0 : index
    %c0_4 = arith.constant 0 : index
    %20 = vector.load %arg3[%c0_3, %c0_4] : memref<104x128xf32, #tpu.memory_space<vmem>>, vector<104x128xf32>
    tpu.vector_store %arg3[%c0_3, %c0_4], %19 {strides = array<i32>} : memref<104x128xf32, #tpu.memory_space<vmem>>, vector<104x128xf32>,
    %21 = math.sin %18 : vector<104x128xf32>
    %c0_5 = arith.constant 0 : index
    %c0_6 = arith.constant 0 : index
    %22 = vector.load %arg4[%c0_5, %c0_6] : memref<104x128xf32, #tpu.memory_space<vmem>>, vector<104x128xf32>
    tpu.vector_store %arg4[%c0_5, %c0_6], %21 {strides = array<i32>} : memref<104x128xf32, #tpu.memory_space<vmem>>, vector<104x128xf32>,
    return
  }
  func.func @transform_0(%arg0: i32) -> (i32, i32) {
    %c0_i32 = arith.constant 0 : i32
    %c0_i32_0 = arith.constant 0 : i32
    return %arg0, %c0_i32 : i32, i32
  }
  func.func @transform_1(%arg0: i32) -> (i32, i32) {
    %c0_i32 = arith.constant 0 : i32
    %c0_i32_0 = arith.constant 0 : i32
    %c0_i32_1 = arith.constant 0 : i32
    return %c0_i32, %c0_i32_0 : i32, i32
  }
  func.func @transform_2(%arg0: i32) -> (i32, i32) {
    %c0_i32 = arith.constant 0 : i32
    %c0_i32_0 = arith.constant 0 : i32
    return %arg0, %c0_i32 : i32, i32
  }
  func.func @transform_3(%arg0: i32) -> (i32, i32) {
    %c0_i32 = arith.constant 0 : i32
    %c0_i32_0 = arith.constant 0 : i32
    return %arg0, %c0_i32 : i32, i32
  }
}

</mosaic_0001>

<bundles_post_ra>
// kernel: tpu_custom_call.1
= control target key start
LH: loop header
LB: loop body
LE: loop exit
PB: predicated region body
PF: predicated region fallthrough
CT: control target
= control target key end

     0   :  { %9 = vsyncpa [#allocation3], 0  ;;  %s5239_s0 = inlined_call_operand.vmem [shape: f32[200,8], index: 0, kind: input, shape index: {}]   ;;  %s5240_s1 = inlined_call_operand.vmem [shape: f32[8,128], index: 1, kind: input, shape index: {}]   ;;  %s5241_s2 = inlined_call_operand.hbm [shape: f32[200,128], index: 2, kind: output, shape index: {0}]   ;;  %s5242_s3 = inlined_call_operand.hbm [shape: f32[200,128], index: 3, kind: output, shape index: {1}]  }
   0x1   :  { %11 = vsyncpa [#allocation3 + $0x1], 0 }
   0x2   :  { %12 = vsyncpa [#allocation5], 0 }
   0x3   :  { %14 = vsyncpa [#allocation5 + $0x1], 0  ;;  %s3750_s12 = smov 0   ;;  %s3752_s13 = smov 0  }
   0x4   :  { %s3754_s14 = smov 0   ;;  %s3756_s15 = smov 0  }
   0x5 LB: > { %s3771_s16 = sadd.s32 4294967295, %s3713_s15   ;;  %s3330_s17 = sadd.s32 4294967294, %s3713_s15   ;;  %s3713_s15 = sphi %s3756_s15, %s5270_s15   ;;  %s3709_s14 = sphi %s3754_s14, %s5269_s14   ;;  %s3705_s13 = sphi %s3752_s13, %s5268_s13   ;;  %s3701_s12 = sphi %s3750_s12, %s5267_s12  }
   0x6   : > { %s3775_s18 = sadd.s32 1, %s3713_s15   ;;  %s74_s19 = sadd.s32 1, %s3709_s14 }
   0x7   : > { %s71_s20 = ssub.s32 %s3713_s15, %s3775_s18  ;;  %p84_p0 = scmp.ne.s32.totalorder %s3709_s14, %s3705_s13 }
   0x8   : > { %p72_p1 = scmp.eq.s32.totalorder %s71_s20, 0  ;;  %p85_p2 = scmp.eq.s32.totalorder %s3771_s16, 1 }
   0x9   : > { %p90_p3 = scmp.ne.s32.totalorder %s3705_s13, %s3701_s12  ;;  %p91_p4 = scmp.eq.s32.totalorder %s3330_s17, 1 }
   0xa   : > { %s3786_s21 = scalar_select %p72_p1, %s3709_s14, %s74_s19  }
   0xb   : > { %p3788_p5 = por %p85_p2, %p84_p0  ;;  %p3792_p6 = por %p91_p4, %p90_p3 }
   0xc   : > { %p3333_p7 = scmp.ge.s32.totalorder %s3713_s15, 1  ;;  %p155_p8 = scmp.lt.s32.totalorder %s3713_s15, 3 }
   0xe   : > { %p156_p9 = pnand %p3333_p7, %p155_p8 }
   0xf   : > { %s3799_s24 = smul.u32 (!%p156_p9), 13, %s3771_s16  ;;  %v3715_v0 = vmov (!%p156_p9), 0   ;;  %v3716_v14 = vmov (!%p156_p9), 1   ;;  %v3717_v15 = vmov (!%p156_p9), 2   ;;  %v291_v16 = vlaneseq (!%p156_p9)  ;;  %v225_v19 = vld [vmem:[%s5240_s1] sm:$0xff] (!%p156_p9)  ;;  %s3822_s5 = sand.u32 (!%p156_p9), 1, %s3705_s13  }
  0x10   : > { %159 = sbr.rel (%p156_p9) target bundleno = 664 (0x298), region = 28  ;;  %3562 = vset.pattern.permute.xlu1 (!%p156_p9), %v3715_v0  ;;  %3561 = vset.pattern.permute.xlu0 (!%p156_p9), %v3715_v0  ;;  %s3190_s9 = scalar_lea.sflag (!%p156_p9), [#allocation3], %s3822_s5 }
  0x11   : > { %p193_p10 = scmp.lt.s32.totalorder (!%p156_p9), %s3799_s24, 24  ;;  %v3806_v17 = vshrl.u32 (!%p156_p9), %v291_v16, 7  ;;  %s3453_s6 = smul.u32 (!%p156_p9), 104, %s3822_s5 }
  0x12   : > { %s3195_s10 = scalar_lea.sflag (!%p156_p9), [#allocation5], %s3822_s5 }
  0x13   : > { %v293_v18 = vsub.s32 (!%p156_p9), 0, %v3806_v17  ;;  %v362_v45 = vsub.s32 (!%p156_p9), 1, %v3806_v17  ;;  %s4136_s7 = scalar_lea.vmem (!%p156_p9), [#allocation2], %s3453_s6  ;;  %s4141_s8 = scalar_lea.vmem (!%p156_p9), [#allocation4], %s3453_s6 }
  0x15   : > { %v3816_v22 = vrot.slane (!%p156_p9), %v225_v19, %v293_v18  ;;  %v363_v48 = vrot.slane (!%p156_p9), %v225_v19, %v362_v45 }
  0x17   : > { %s194_s25 = scalar_select %p193_p10, %s3799_s24, 24 }
  0x18   : > { %s3203_s11 = ssub.s32 (%p3788_p5), 25, %s3799_s24 }
  0x19   : > { %s3334_s26 = sshll.u32 %s194_s25, 3  ;;  %p3204_p11 = scmp.lt.s32.totalorder (%p3788_p5), %s3203_s11, 13 }
  0x1a   : > { %s196_s29 = scalar_lea.vmem %s5239_s0, %s3334_s26 }
  0x1b   : > { %v214_v1 = vld [vmem:[%s196_s29 + $0x10] sm:$0xff]  ;;  %v212_v2 = vld [vmem:[%s196_s29] sm:$0xff]  ;;  %v215_v3 = vld [vmem:[%s196_s29 + $0x18] sm:$0xff] }
  0x1c   : > { %238 = vperm.xlu1 %3562, %v214_v1   ;;  %228 = vperm.xlu0 %3561, %v212_v2   ;;  %v213_v4 = vld [vmem:[%s196_s29 + $0x8] sm:$0xff]  ;;  %v216_v6 = vld [vmem:[%s196_s29 + $0x20] sm:$0xff]  ;;  %v219_v7 = vld [vmem:[%s196_s29 + $0x38] sm:$0xff] }
  0x1d   : > { %v217_v5 = vld [vmem:[%s196_s29 + $0x28] sm:$0xff]  ;;  %v218_v8 = vld [vmem:[%s196_s29 + $0x30] sm:$0xff]  ;;  %v220_v10 = vld [vmem:[%s196_s29 + $0x40] sm:$0xff] }
  0x1e   : > { %v221_v9 = vld [vmem:[%s196_s29 + $0x48] sm:$0xff]  ;;  %v223_v11 = vld [vmem:[%s196_s29 + $0x58] sm:$0xff]  ;;  %v222_v12 = vld [vmem:[%s196_s29 + $0x50] sm:$0xff] }
  0x1f   : > { %v224_v13 = vld [vmem:[%s196_s29 + $0x60] sm:$0xff] }
  0x20   : > { %243 = vperm.xlu1 %3562, %v215_v3   ;;  %233 = vperm.xlu0 %3561, %v213_v4  }
  0x24   : > { %253 = vperm.xlu1 %3562, %v217_v5   ;;  %248 = vperm.xlu0 %3561, %v216_v6  }
  0x28   : > { %263 = vperm.xlu1 %3562, %v219_v7   ;;  %258 = vperm.xlu0 %3561, %v218_v8  }
  0x2c   : > { %273 = vperm.xlu1 %3562, %v221_v9   ;;  %268 = vperm.xlu0 %3561, %v220_v10  }
  0x30   : > { %283 = vperm.xlu1 %3562, %v223_v11   ;;  %278 = vperm.xlu0 %3561, %v222_v12  }
  0x34   : > { %3563 = vset.pattern.permute.xlu1 %v3716_v14  ;;  %288 = vperm.xlu0 %3561, %v224_v13  }
  0x35   : > { %309 = vperm.xlu1 %3563, %v212_v2  }
  0x38   : > { %3564 = vset.pattern.permute.xlu0 %v3716_v14 }
  0x39   : > { %317 = vperm.xlu1 %3563, %v214_v1   ;;  %313 = vperm.xlu0 %3564, %v213_v4  }
  0x3d   : > { %321 = vperm.xlu1 %3563, %v215_v3   ;;  %325 = vperm.xlu0 %3564, %v216_v6  }
  0x41   : > { %329 = vperm.xlu1 %3563, %v217_v5   ;;  %333 = vperm.xlu0 %3564, %v218_v8  }
  0x45   : > { %337 = vperm.xlu1 %3563, %v219_v7   ;;  %341 = vperm.xlu0 %3564, %v220_v10  }
  0x49   : > { %345 = vperm.xlu1 %3563, %v221_v9   ;;  %349 = vperm.xlu0 %3564, %v222_v12  }
  0x4d   : > { %353 = vperm.xlu1 %3563, %v223_v11   ;;  %357 = vperm.xlu0 %3564, %v224_v13  }
  0x51   : > { %3565 = vset.pattern.permute.xlu1 %v3717_v15  ;;  %3566 = vset.pattern.permute.xlu0 %v3717_v15 }
  0x52   : > { %391 = vperm.xlu1 %3565, %v212_v2   ;;  %395 = vperm.xlu0 %3566, %v213_v4  }
  0x56   : > { %399 = vperm.xlu1 %3565, %v214_v1   ;;  %407 = vperm.xlu0 %3566, %v216_v6  }
  0x5a   : > { %403 = vperm.xlu1 %3565, %v215_v3   ;;  %415 = vperm.xlu0 %3566, %v218_v8  }
  0x5e   : > { %411 = vperm.xlu1 %3565, %v217_v5   ;;  %423 = vperm.xlu0 %3566, %v220_v10  }
  0x62   : > { %419 = vperm.xlu1 %3565, %v219_v7   ;;  %431 = vperm.xlu0 %3566, %v222_v12   ;;  %v444_v7 = vsub.s32 2, %v3806_v17 }
  0x64   : > { %v3849_v16 = vrot.slane %v225_v19, %v444_v7 }
  0x66   : > { %427 = vperm.xlu1 %3565, %v221_v9   ;;  %439 = vperm.xlu0 %3566, %v224_v13  }
  0x6a   : > { %435 = vperm.xlu1 %3565, %v223_v11  }
  0x9b   : > { %v3812_v20 = vpop.permute.xlu1 %238  ;;  %v3814_v21 = vpop.permute.xlu0 %228 }
  0x9f   : > { %v244_v23 = vpop.permute.xlu1 %243  ;;  %v234_v24 = vpop.permute.xlu0 %233 }
  0xa0   : > { %v298_v25 = vmul.f32 %v3816_v22, %v244_v23  ;;  %v296_v17 = vmul.f32 %v3816_v22, %v234_v24 }
  0xa3   : > { %v254_v26 = vpop.permute.xlu1 %253  ;;  %v249_v27 = vpop.permute.xlu0 %248 }
  0xa4   : > { %v300_v28 = vmul.f32 %v3816_v22, %v254_v26  ;;  %v299_v29 = vmul.f32 %v3816_v22, %v249_v27 }
  0xa7   : > { %v264_v30 = vpop.permute.xlu1 %263  ;;  %v259_v31 = vpop.permute.xlu0 %258 }
  0xa8   : > { %v302_v32 = vmul.f32 %v3816_v22, %v264_v30  ;;  %v301_v33 = vmul.f32 %v3816_v22, %v259_v31 }
  0xab   : > { %v274_v34 = vpop.permute.xlu1 %273  ;;  %v269_v35 = vpop.permute.xlu0 %268 }
  0xac   : > { %v304_v36 = vmul.f32 %v3816_v22, %v274_v34  ;;  %v303_v37 = vmul.f32 %v3816_v22, %v269_v35  ;;  %v297_v35 = vmul.f32 %v3816_v22, %v3812_v20 }
  0xaf   : > { %v284_v38 = vpop.permute.xlu1 %283  ;;  %v279_v39 = vpop.permute.xlu0 %278 }
  0xb0   : > { %v306_v40 = vmul.f32 %v3816_v22, %v284_v38  ;;  %v305_v41 = vmul.f32 %v3816_v22, %v279_v39 }
  0xb3   : > { %v289_v42 = vpop.permute.xlu0 %288 }
  0xb4   : > { %v307_v43 = vmul.f32 %v3816_v22, %v289_v42  ;;  %v310_v44 = vpop.permute.xlu1 %309 }
  0xb5   : > { %v364_v14 = vmul.f32 %v363_v48, %v310_v44 }
  0xb8   : > { %v318_v46 = vpop.permute.xlu1 %317  ;;  %v314_v47 = vpop.permute.xlu0 %313 }
  0xb9   : > { %v365_v15 = vmul.f32 %v363_v48, %v314_v47 }
  0xbc   : > { %v322_v49 = vpop.permute.xlu1 %321  ;;  %v326_v50 = vpop.permute.xlu0 %325 }
  0xbd   : > { %v367_v51 = vmul.f32 %v363_v48, %v322_v49  ;;  %v368_v52 = vmul.f32 %v363_v48, %v326_v50 }
  0xbf   : > { %v3832_v53 = vadd.f32 %v367_v51, %v298_v25  ;;  %v3834_v54 = vadd.f32 %v368_v52, %v299_v29  ;;  %v295_v25 = vmul.f32 %v3816_v22, %v3814_v21  ;;  %v378_v29 = vadd.f32 %v365_v15, %v296_v17 }
  0xc0   : > { %v330_v55 = vpop.permute.xlu1 %329  ;;  %v334_v56 = vpop.permute.xlu0 %333 }
  0xc1   : > { %v369_v57 = vmul.f32 %v363_v48, %v330_v55  ;;  %v370_v58 = vmul.f32 %v363_v48, %v334_v56 }
  0xc3   : > { %v3836_v59 = vadd.f32 %v369_v57, %v300_v28  ;;  %v3838_v60 = vadd.f32 %v370_v58, %v301_v33  ;;  %v377_v28 = vadd.f32 %v364_v14, %v295_v25  ;;  %v3722_v14 = vmov 920167782  }
  0xc4   : > { %v338_v61 = vpop.permute.xlu1 %337  ;;  %v342_v62 = vpop.permute.xlu0 %341 }
  0xc5   : > { %v371_v63 = vmul.f32 %v363_v48, %v338_v61  ;;  %v372_v0 = vmul.f32 %v363_v48, %v342_v62 }
  0xc7   : > { %v3840_v1 = vadd.f32 %v371_v63, %v302_v32  ;;  %v3842_v2 = vadd.f32 %v372_v0, %v303_v37  ;;  %v366_v32 = vmul.f32 %v363_v48, %v318_v46  ;;  %v3718_v0 = vmov 683565275  }
  0xc8   : > { %v346_v3 = vpop.permute.xlu1 %345  ;;  %v350_v4 = vpop.permute.xlu0 %349 }
  0xc9   : > { %v373_v5 = vmul.f32 %v363_v48, %v346_v3  ;;  %v374_v6 = vmul.f32 %v363_v48, %v350_v4  ;;  %v379_v38 = vadd.f32 %v366_v32, %v297_v35 }
  0xcb   : > { %v3845_v8 = vadd.f32 %v373_v5, %v304_v36  ;;  %v3847_v9 = vadd.f32 %v374_v6, %v305_v41  ;;  %v3719_v6 = vmov 2475754826  }
  0xcc   : > { %v354_v10 = vpop.permute.xlu1 %353  ;;  %v358_v11 = vpop.permute.xlu0 %357 }
  0xcd   : > { %v375_v12 = vmul.f32 %v363_v48, %v354_v10  ;;  %v376_v13 = vmul.f32 %v363_v48, %v358_v11  ;;  %v3720_v10 = vmov 2131351028  }
  0xcf   : > { %v3851_v18 = vadd.f32 %v375_v12, %v306_v40  ;;  %v3853_v23 = vadd.f32 %v376_v13, %v307_v43  ;;  %v3721_v12 = vmov 2102212464  }
  0xd1   : > { %v392_v26 = vpop.permute.xlu1 %391  ;;  %v396_v27 = vpop.permute.xlu0 %395 }
  0xd2   : > { %v446_v30 = vmul.f32 %v3849_v16, %v392_v26  ;;  %v447_v31 = vmul.f32 %v3849_v16, %v396_v27 }
  0xd4   : > { %v3860_v19 = vadd.f32 %v446_v30, %v377_v28  ;;  %v3862_v33 = vadd.f32 %v447_v31, %v378_v29  ;;  %v3723_v29 = vmov 1326507024  }
  0xd5   : > { %v400_v34 = vpop.permute.xlu1 %399 }
  0xd6   : > { %v472_v21 = vand.u32 2147483647, %v3860_v19  ;;  %v475_v24 = vand.u32 2139095040, %v3860_v19  ;;  %v575_v36 = vand.u32 2147483647, %v3862_v33  ;;  %v578_v37 = vand.u32 2139095040, %v3862_v33 }
  0xd7   : > { %v448_v40 = vmul.f32 %v3849_v16, %v400_v34  ;;  %vm474_vm13 = vcmp.lt.s32.totalorder %v3860_v19, 0 }
  0xd8   : > { %v476_v39 = vshrl.u32 %v475_v24, 23  ;;  %v479_v41 = vand.u32 8388607, %v472_v21  ;;  %v579_v42 = vshrl.u32 %v578_v37, 23  ;;  %v582_v43 = vand.u32 8388607, %v575_v36 }
  0xd9   : > { %v3875_v22 = vadd.f32 %v448_v40, %v379_v38  ;;  %vm3962_vm14 = vcmp.le.f32.partialorder %v472_v21, 0.7853982 }
  0xda   : > { %v3335_v20 = vadd.s32 4294967169, %v476_v39  ;;  %v3339_v44 = vadd.s32 4294967169, %v579_v42  ;;  %v480_v46 = vor.u32 8388608, %v479_v41  ;;  %v583_v47 = vor.u32 8388608, %v582_v43 }
  0xdb   : > { %v681_v49 = vand.u32 2139095040, %v3875_v22  ;;  %v678_v62 = vand.u32 2147483647, %v3875_v22 }
  0xdc   : > { %v482_v45 = vadd.s32 1, %v3335_v20  ;;  %v585_v48 = vadd.s32 1, %v3339_v44  ;;  %v3878_v57 = vshll.u32 %v480_v46, 8  ;;  %v3882_v61 = vshll.u32 %v583_v47, 8 }
  0xdd   : > { %v682_v51 = vshrl.u32 %v681_v49, 23 }
  0xde   : > { %vm483_vm0 = vcmp.gt.s32.totalorder %v482_v45, 0  ;;  %vm586_vm1 = vcmp.gt.s32.totalorder %v585_v48, 0 }
  0xdf   : > { %v484_v50 = vsel %vm483_vm0, %v482_v45, 0  ;;  %v587_v56 = vsel %vm586_vm1, %v585_v48, 0  ;;  %v3886_v5 = vadd.s32 4294967169, %v682_v51  ;;  %vm577_vm0 = vcmp.lt.s32.totalorder %v3862_v33, 0 }
  0xe0   : > { %v485_v52 = vshrl.u32 %v484_v50, 5  ;;  %v486_v55 = vand.u32 31, %v484_v50  ;;  %v3880_v58 = vshrl.u32 %v587_v56, 5  ;;  %v589_v4 = vand.u32 31, %v587_v56 }
  0xe2   : > { %v487_v63 = vsub.s32 32, %v486_v55  ;;  %v489_v3 = vshll.u32 %v3718_v0, %v486_v55  ;;  %v492_v7 = vshll.u32 %v3719_v6, %v486_v55  ;;  %v495_v11 = vshll.u32 %v3720_v10, %v486_v55 }
  0xe3   : > { %v498_v13 = vshll.u32 %v3721_v12, %v486_v55  ;;  %v501_v15 = vshll.u32 %v3722_v14, %v486_v55  ;;  %vm504_vm2 = vcmp.lt.s32.totalorder %v485_v52, 1  ;;  %vm505_vm3 = vcmp.lt.s32.totalorder %v485_v52, 2 }
  0xe4   : > { %v490_v25 = vshrl.u32 %v3719_v6, %v487_v63  ;;  %v493_v17 = vshrl.u32 %v3720_v10, %v487_v63  ;;  %v496_v26 = vshrl.u32 %v3721_v12, %v487_v63  ;;  %v488_v27 = vshrl.u32 %v3718_v0, %v487_v63 }
  0xe5   : > { %v499_v28 = vshrl.u32 %v3722_v14, %v487_v63  ;;  %v502_v30 = vshrl.u32 %v3723_v29, %v487_v63  ;;  %v590_v35 = vsub.s32 32, %v589_v4  ;;  %vm506_vm4 = vcmp.lt.s32.totalorder %v485_v52, 3 }
  0xe6   : > { %v491_v31 = vor.u32 %v490_v25, %v489_v3  ;;  %v494_v32 = vor.u32 %v493_v17, %v492_v7  ;;  %v497_v34 = vor.u32 %v496_v26, %v495_v11  ;;  %vm507_vm5 = vcmp.lt.s32.totalorder %v485_v52, 4 }
  0xe7   : > { %v500_v24 = vor.u32 %v499_v28, %v498_v13  ;;  %v503_v37 = vor.u32 %v502_v30, %v501_v15  ;;  %v592_v44 = vshll.u32 %v3718_v0, %v589_v4  ;;  %v593_v47 = vshrl.u32 %v3719_v6, %v590_v35 }
  0xe8   : > { %v508_v38 = vsel %vm504_vm2, %v488_v27, %v491_v31  ;;  %v509_v39 = vsel %vm507_vm5, %v497_v34, 2102212464  ;;  %v512_v40 = vsel %vm504_vm2, %v491_v31, %v494_v32  ;;  %v516_v41 = vsel %vm504_vm2, %v494_v32, %v497_v34 }
  0xe9   : > { %v510_v42 = vsel %vm506_vm4, %v494_v32, %v509_v39  ;;  %v513_v43 = vsel %vm507_vm5, %v500_v24, 920167782  ;;  %v517_v20 = vsel %vm507_vm5, %v503_v37, 1326507024  ;;  %v595_v48 = vshll.u32 %v3719_v6, %v589_v4 }
  0xea   : > { %v514_v45 = vsel %vm506_vm4, %v497_v34, %v513_v43  ;;  %v518_v46 = vsel %vm506_vm4, %v500_v24, %v517_v20  ;;  %v511_v49 = vsel %vm505_vm3, %v508_v38, %v510_v42  ;;  %v596_v55 = vshrl.u32 %v3720_v10, %v590_v35  ;;  %v408_v43 = vpop.permute.xlu0 %407 }
  0xeb   : > { %v515_v50 = vsel %vm505_vm3, %v512_v40, %v514_v45  ;;  %v519_v51 = vsel %vm505_vm3, %v516_v41, %v518_v46  ;;  %v594_v11 = vor.u32 %v593_v47, %v592_v44  ;;  %v598_v15 = vshll.u32 %v3720_v10, %v589_v4 }
  0xec   : > { %v3909_v56 = vmul.u32.u64.low %v3878_v57, %v519_v51  ;;  %v3910_v63 = vmul.u32.u64.high %v3878_v57, %v519_v51, %v3909_v56  ;;  %v3913_v3 = vmul.u32.u64.low %v3878_v57, %v515_v50  ;;  %v3914_v7 = vmul.u32.u64.high %v3878_v57, %v515_v50, %v3913_v3 }
  0xed   : > { %v597_v13 = vor.u32 %v596_v55, %v595_v48  ;;  %v599_v25 = vshrl.u32 %v3721_v12, %v590_v35  ;;  %v591_v52 = vshrl.u32 %v3718_v0, %v590_v35  ;;  %v601_v17 = vshll.u32 %v3721_v12, %v589_v4 }
  0xee   : > { %v602_v26 = vshrl.u32 %v3722_v14, %v590_v35  ;;  %v605_v27 = vshrl.u32 %v3723_v29, %v590_v35  ;;  %v527_v28 = vmul.u32 %v3878_v57, %v511_v49  ;;  %v604_v31 = vshll.u32 %v3722_v14, %v589_v4 }
  0xef   : > { %v600_v30 = vor.u32 %v599_v25, %v598_v15  ;;  %vm607_vm6 = vcmp.lt.s32.totalorder %v3880_v58, 1  ;;  %vm529_vm7 = vc.u32 %v3910_v63, %v3913_v3  ;;  %v530_v32 = vadd.s32 1, %v3914_v7 }
  0xf0   : > { %v603_v34 = vor.u32 %v602_v26, %v601_v17  ;;  %vm608_vm8 = vcmp.lt.s32.totalorder %v3880_v58, 2  ;;  %v606_v24 = vor.u32 %v605_v27, %v604_v31  ;;  %vm609_vm9 = vcmp.lt.s32.totalorder %v3880_v58, 3 }
  0xf1   : > { %vm610_vm10 = vcmp.lt.s32.totalorder %v3880_v58, 4  ;;  %v615_v35 = vsel %vm607_vm6, %v594_v11, %v597_v13  ;;  %v531_v57 = vsel %vm529_vm7, %v530_v32, %v3914_v7  ;;  %v619_v38 = vsel %vm607_vm6, %v597_v13, %v600_v30 }
  0xf2   : > { %v612_v37 = vsel %vm610_vm10, %v600_v30, 2102212464  ;;  %v616_v4 = vsel %vm610_vm10, %v603_v34, 920167782  ;;  %v532_v39 = vadd.s32 %v531_v57, %v527_v28  ;;  %v611_v40 = vsel %vm607_vm6, %v591_v52, %v594_v11 }
  0xf3   : > { %v617_v41 = vsel %vm609_vm9, %v600_v30, %v616_v4  ;;  %v620_v42 = vsel %vm610_vm10, %v606_v24, 1326507024  ;;  %v613_v20 = vsel %vm609_vm9, %v597_v13, %v612_v37  ;;  %v688_v46 = vadd.s32 1, %v3886_v5 }
  0xf4   : > { %v618_v44 = vsel %vm608_vm8, %v615_v35, %v617_v41  ;;  %v621_v45 = vsel %vm609_vm9, %v603_v34, %v620_v42  ;;  %v533_v47 = vadd.s32 536870912, %v532_v39  ;;  %v450_v56 = vmul.f32 %v3849_v16, %v408_v43  ;;  %v404_v34 = vpop.permute.xlu1 %403 }
  0xf5   : > { %v622_v48 = vsel %vm608_vm8, %v619_v38, %v621_v45  ;;  %v3939_v49 = vmul.u32.u64.low %v3882_v61, %v618_v44  ;;  %v3940_v50 = vmul.u32.u64.high %v3882_v61, %v618_v44, %v3939_v49  ;;  %vm689_vm11 = vcmp.gt.s32.totalorder %v688_v46, 0 }
  0xf6   : > { %v3943_v51 = vmul.u32.u64.low %v3882_v61, %v622_v48  ;;  %v3944_v55 = vmul.u32.u64.high %v3882_v61, %v622_v48, %v3943_v51  ;;  %v534_v7 = vshrl.u32 %v533_v47, 30  ;;  %v614_v11 = vsel %vm608_vm8, %v611_v40, %v613_v20 }
  0xf7   : > { %v690_v5 = vsel %vm689_vm11, %v688_v46, 0  ;;  %v633_v15 = vadd.s32 1, %v3940_v50  ;;  %v685_v25 = vand.u32 8388607, %v678_v62  ;;  %v630_v17 = vmul.u32 %v3882_v61, %v614_v11 }
  0xf8   : > { %v535_v13 = vshll.u32 %v534_v7, 30  ;;  %v692_v52 = vand.u32 31, %v690_v5  ;;  %vm632_vm12 = vc.u32 %v3944_v55, %v3939_v49  ;;  %v3955_v26 = vadd.f32 %v450_v56, %v3834_v54 }
  0xf9   : > { %v634_v28 = vsel %vm632_vm12, %v633_v15, %v3940_v50  ;;  %v686_v31 = vor.u32 8388608, %v685_v25  ;;  %v558_v24 = vsub.s32 4, %v534_v7  ;;  %v3970_v38 = vmul.f32 %v3849_v16, %v404_v34 }
  0xfa   : > { %v536_v27 = vsub.s32 %v532_v39, %v535_v13  ;;  %v635_v58 = vadd.s32 %v634_v28, %v630_v17  ;;  %v693_v32 = vsub.s32 32, %v692_v52  ;;  %v887_v57 = vand.u32 2139095040, %v3955_v26 }
  0xfb   : > { %v884_v4 = vand.u32 2147483647, %v3955_v26  ;;  %v528_v39 = vadd.s32 %v3913_v3, %v3910_v63  ;;  %v3975_v42 = vshll.u32 %v686_v31, 8  ;;  %v559_v21 = vsel %vm474_vm13, %v558_v24, %v534_v7 }
  0xfc   : > { %v538_v30 = vsub.s32 0, %v536_v27  ;;  %v636_v35 = vadd.s32 536870912, %v635_v58  ;;  %v696_v41 = vshrl.u32 %v3719_v6, %v693_v32  ;;  %v3980_v20 = vshrl.u32 %v690_v5, 5 }
  0xfd   : > { %v888_v44 = vshrl.u32 %v887_v57, 23  ;;  %v695_v46 = vshll.u32 %v3718_v0, %v692_v52  ;;  %v699_v47 = vshrl.u32 %v3720_v10, %v693_v32  ;;  %v705_v63 = vshrl.u32 %v3722_v14, %v693_v32 }
  0xfe   : > { %v3336_v61 = vmin.u32 %v538_v30, %v536_v27  ;;  %v3966_v37 = vshrl.u32 %v636_v35, 30  ;;  %v631_v3 = vadd.s32 %v3939_v49, %v3944_v55  ;;  %v698_v50 = vshll.u32 %v3719_v6, %v692_v52 }
  0xff   : > { %v702_v51 = vshrl.u32 %v3721_v12, %v693_v32  ;;  %v3992_v56 = vsel %vm3962_vm14, 0, %v559_v21  ;;  %v697_v7 = vor.u32 %v696_v41, %v695_v46  ;;  %v704_v11 = vshll.u32 %v3721_v12, %v692_v52 }
 0x100   : > { %v540_v40 = vclz %v3336_v61  ;;  %v638_v43 = vshll.u32 %v3966_v37, 30  ;;  %v701_v15 = vshll.u32 %v3720_v10, %v692_v52  ;;  %v708_v49 = vshrl.u32 %v3723_v29, %v693_v32 }
 0x101   : > { %v700_v17 = vor.u32 %v699_v47, %v698_v50  ;;  %v706_v28 = vor.u32 %v705_v63, %v704_v11  ;;  %v694_v30 = vshrl.u32 %v3718_v0, %v693_v32  ;;  %v707_v34 = vshll.u32 %v3722_v14, %v692_v52 }
 0x102   : > { %v3337_v45 = vadd.s32 4294967294, %v540_v40  ;;  %v3986_v48 = vsub.s32 %v635_v58, %v638_v43  ;;  %v703_v31 = vor.u32 %v702_v51, %v701_v15  ;;  %v661_v61 = vsub.s32 4, %v3966_v37 }
 0x103   : > { %v709_v41 = vor.u32 %v708_v49, %v707_v34  ;;  %vm710_vm1 = vcmp.lt.s32.totalorder %v3980_v20, 1  ;;  %vm713_vm2 = vcmp.lt.s32.totalorder %v3980_v20, 4  ;;  %vm711_vm3 = vcmp.lt.s32.totalorder %v3980_v20, 2 }
 0x104   : > { %vm3338_vm15 = vcmp.lt.s32.totalorder %v3337_v45, 0  ;;  %v641_v13 = vsub.s32 0, %v3986_v48  ;;  %v719_v32 = vsel %vm713_vm2, %v706_v28, 920167782  ;;  %vm712_vm4 = vcmp.lt.s32.totalorder %v3980_v20, 3 }
 0x105   : > { %v543_v5 = vsel %vm3338_vm15, 0, %v3337_v45  ;;  %v718_v45 = vsel %vm710_vm1, %v697_v7, %v700_v17  ;;  %vm4011_vm5 = vcmp.le.f32.partialorder %v575_v36, 0.7853982  ;;  %v715_v47 = vsel %vm713_vm2, %v703_v31, 2102212464 }
 0x106   : > { %v544_v55 = vsub.s32 32, %v543_v5  ;;  %v548_v25 = vsub.s32 4294967266, %v543_v5  ;;  %v3340_v58 = vmin.u32 %v641_v13, %v3986_v48  ;;  %v545_v24 = vshll.u32 %v536_v27, %v543_v5 }
 0x107   : > { %v714_v27 = vsel %vm710_vm1, %v694_v30, %v697_v7  ;;  %v720_v63 = vsel %vm712_vm4, %v703_v31, %v719_v32  ;;  %v722_v50 = vsel %vm710_vm1, %v700_v17, %v703_v31  ;;  %v723_v7 = vsel %vm713_vm2, %v709_v41, 1326507024 }
 0x108   : > { %v546_v35 = vshrl.u32 %v528_v39, %v544_v55  ;;  %v549_v57 = vadd.s32 127, %v548_v25  ;;  %v643_v40 = vclz %v3340_v58  ;;  %v721_v11 = vsel %vm711_vm3, %v718_v45, %v720_v63 }
 0x109   : > { %v724_v13 = vsel %vm712_vm4, %v706_v28, %v723_v7  ;;  %v3351_v15 = vadd.s32 4294967169, %v888_v44  ;;  %v716_v25 = vsel %vm712_vm4, %v700_v17, %v715_v47  ;;  %v1917_v41 = vadd.s32 3, %v3992_v56 }
 0x10a   : > { %v547_v21 = vor.u32 %v546_v35, %v545_v24  ;;  %v550_v43 = vshll.u32 %v549_v57, 23  ;;  %v3341_v52 = vadd.s32 4294967294, %v643_v40  ;;  %v725_v58 = vsel %vm711_vm3, %v722_v50, %v724_v13 }
 0x10b   : > { %v4031_v34 = vmul.u32.u64.low %v3975_v42, %v725_v58  ;;  %v4032_v24 = vmul.u32.u64.high %v3975_v42, %v725_v58, %v4031_v34  ;;  %v4035_v28 = vmul.u32.u64.low %v3975_v42, %v721_v11  ;;  %v4036_v44 = vmul.u32.u64.high %v3975_v42, %v721_v11, %v4035_v28 }
 0x10c   : > { %v551_v39 = vor.u32 4788187, %v550_v43  ;;  %v554_v51 = vcvt.s32.f32 %v547_v21  ;;  %vm3342_vm6 = vcmp.lt.s32.totalorder %v3341_v52, 0  ;;  %v662_v17 = vsel %vm577_vm0, %v661_v61, %v3966_v37 }
 0x10d   : > { %v646_v36 = vsel %vm3342_vm6, 0, %v3341_v52  ;;  %v894_v21 = vadd.s32 1, %v3351_v15  ;;  %v717_v45 = vsel %vm711_vm3, %v714_v27, %v716_v25  ;;  %v4049_v52 = vand.u32 3, %v3992_v56 }
 0x10e   : > { %v552_v5 = vand.u32 2147483647, %v551_v39  ;;  %v647_v49 = vsub.s32 32, %v646_v36  ;;  %v651_v55 = vsub.s32 4294967266, %v646_v36  ;;  %v648_v31 = vshll.u32 %v3986_v48, %v646_v36 }
 0x10f   : > { %vm735_vm7 = vc.u32 %v4032_v24, %v4035_v28  ;;  %vm895_vm8 = vcmp.gt.s32.totalorder %v894_v21, 0  ;;  %v664_v20 = vsel %vm4011_vm5, 0, %v662_v17  ;;  %v736_v27 = vadd.s32 1, %v4036_v44 }
 0x110   : > { %v555_v30 = vmul.f32 %v554_v51, %v552_v5  ;;  %v649_v35 = vshrl.u32 %v631_v3, %v647_v49  ;;  %v652_v57 = vadd.s32 127, %v651_v55  ;;  %v891_v3 = vand.u32 8388607, %v884_v4 }
 0x111   : > { %v4058_v39 = vand.u32 3, %v1917_v41  ;;  %v733_v47 = vmul.u32 %v3975_v42, %v717_v45  ;;  %v896_v56 = vsel %vm895_vm8, %v894_v21, 0  ;;  %v737_v51 = vsel %vm735_vm7, %v736_v27, %v4036_v44 }
 0x112   : > { %v556_v40 = vxor.u32 2147483648, %v555_v30  ;;  %v650_v43 = vor.u32 %v649_v35, %v648_v31  ;;  %v653_v48 = vshll.u32 %v652_v57, 23  ;;  %v2021_v11 = vadd.s32 3, %v664_v20 }
 0x113   : > { %v738_v54 = vadd.s32 %v737_v51, %v733_v47  ;;  %v892_v7 = vor.u32 8388608, %v891_v3  ;;  %v898_v5 = vand.u32 31, %v896_v56  ;;  %v4064_v13 = vadd.f32 %v3970_v38, %v3832_v53 }
 0x114   : > { %v557_v32 = vsel %vm474_vm13, %v556_v40, %v555_v30  ;;  %v654_v61 = vor.u32 4788187, %v653_v48  ;;  %v657_v50 = vcvt.s32.f32 %v650_v43  ;;  %vm567_vm9 = vcmp.eq.s32.totalorder %v4049_v52, 0 }
 0x115   : > { %v560_v37 = vsel %vm3962_vm14, %v3860_v19, %v557_v32  ;;  %v739_v15 = vadd.s32 536870912, %v738_v54  ;;  %v899_v49 = vsub.s32 32, %v898_v5  ;;  %vm570_vm10 = vcmp.eq.s32.totalorder %v4049_v52, 2 }
 0x116   : > { %3567 = vcosq.f32 %v560_v37  ;;  %v655_v63 = vand.u32 2147483647, %v654_v61  ;;  %vm1920_vm11 = vcmp.eq.s32.totalorder %v4058_v39, 0  ;;  %vm1923_vm12 = vcmp.eq.s32.totalorder %v4058_v39, 2 }
 0x117   : > { %3569 = vsinq.f32 %v560_v37  ;;  %vm566_vm13 = vcmp.lt.s32.totalorder %v4049_v52, 2  ;;  %vm1919_vm14 = vcmp.lt.s32.totalorder %v4058_v39, 2  ;;  %v4072_v55 = vand.u32 3, %v664_v20 }
 0x118   : > { %v658_v36 = vmul.f32 %v657_v50, %v655_v63  ;;  %v4074_v25 = vand.u32 3, %v2021_v11  ;;  %v4076_v53 = vshrl.u32 %v739_v15, 30  ;;  %v4078_v38 = vshll.u32 %v892_v7, 8 }
 0x119   : > { %vm564_vm15 = vweird.f32 %v3860_v19  ;;  %v4084_v30 = vadd.s32 %v4035_v28, %v4032_v24  ;;  %v4086_v31 = vshrl.u32 %v896_v56, 5  ;;  %v784_v34 = vand.u32 2139095040, %v4064_v13 }
 0x11a   : > { %v659_v42 = vxor.u32 2147483648, %v658_v36  ;;  %v741_v57 = vshll.u32 %v4076_v53, 30  ;;  %v905_v44 = vshrl.u32 %v3720_v10, %v899_v49  ;;  %v908_v40 = vshrl.u32 %v3721_v12, %v899_v49 }
 0x11b   : > { %v904_v41 = vshll.u32 %v3719_v6, %v898_v5  ;;  %v911_v24 = vshrl.u32 %v3722_v14, %v899_v49  ;;  %v914_v28 = vshrl.u32 %v3723_v29, %v899_v49  ;;  %v902_v46 = vshrl.u32 %v3719_v6, %v899_v49 }
 0x11c   : > { %v660_v58 = vsel %vm577_vm0, %v659_v42, %v658_v36  ;;  %v4099_v21 = vsub.s32 %v738_v54, %v741_v57  ;;  %v907_v43 = vshll.u32 %v3720_v10, %v898_v5  ;;  %v901_v3 = vshll.u32 %v3718_v0, %v898_v5 }
 0x11d   : > { %v663_v35 = vsel %vm4011_vm5, %v3862_v33, %v660_v58  ;;  %v910_v32 = vshll.u32 %v3721_v12, %v898_v5  ;;  %v913_v37 = vshll.u32 %v3722_v14, %v898_v5  ;;  %v906_v27 = vor.u32 %v905_v44, %v904_v41 }
 0x11e   : > { %3571 = vcosq.f32 %v663_v35  ;;  %v744_v20 = vsub.s32 0, %v4099_v21  ;;  %v909_v47 = vor.u32 %v908_v40, %v907_v43  ;;  %vm673_vm0 = vcmp.eq.s32.totalorder %v4072_v55, 2 }
 0x11f   : > { %3573 = vsinq.f32 %v663_v35  ;;  %vm2027_vm1 = vcmp.eq.s32.totalorder %v4074_v25, 2  ;;  %v912_v50 = vor.u32 %v911_v24, %v910_v32  ;;  %v915_v51 = vor.u32 %v914_v28, %v913_v37 }
 0x120   : > { %v3568_v17 = vpop.eup %3567  ;;  %vm670_vm2 = vcmp.eq.s32.totalorder %v4072_v55, 0  ;;  %vm2024_vm3 = vcmp.eq.s32.totalorder %v4074_v25, 0  ;;  %v3344_v7 = vmin.u32 %v744_v20, %v4099_v21  ;;  %v903_v5 = vor.u32 %v902_v46, %v901_v3 }
 0x121   : > { %v3570_v48 = vpop.eup %3569  ;;  %v571_v45 = vxor.u32 2147483648, %v3568_v17  ;;  %vm669_vm4 = vcmp.lt.s32.totalorder %v4072_v55, 2  ;;  %vm2023_vm5 = vcmp.lt.s32.totalorder %v4074_v25, 2  ;;  %v900_v42 = vshrl.u32 %v3718_v0, %v899_v49 }
 0x122   : > { %v568_v61 = vxor.u32 2147483648, %v3570_v48  ;;  %vm916_vm6 = vcmp.lt.s32.totalorder %v4086_v31, 1  ;;  %vm667_vm7 = vweird.f32 %v3862_v33  ;;  %v746_v52 = vclz %v3344_v7  ;;  %v416_v7 = vpop.permute.xlu0 %415 }
 0x123   : > { %v572_v56 = vsel %vm570_vm10, %v571_v45, %v3570_v48  ;;  %v1925_v63 = vsel %vm1923_vm12, %v571_v45, %v3570_v48  ;;  %vm919_vm8 = vcmp.lt.s32.totalorder %v4086_v31, 4  ;;  %v928_v19 = vsel %vm916_vm6, %v906_v27, %v909_v47 }
 0x124   : > { %v569_v11 = vsel %vm567_vm9, %v3568_v17, %v568_v61  ;;  %v1922_v54 = vsel %vm1920_vm11, %v3568_v17, %v568_v61  ;;  %vm917_vm9 = vcmp.lt.s32.totalorder %v4086_v31, 2  ;;  %v925_v39 = vsel %vm919_vm8, %v912_v50, 920167782 }
 0x125   : > { %v573_v36 = vsel %vm566_vm13, %v569_v11, %v572_v56  ;;  %v1926_v15 = vsel %vm1919_vm14, %v1922_v54, %v1925_v63  ;;  %v929_v49 = vsel %vm919_vm8, %v915_v51, 1326507024  ;;  %v3345_v57 = vadd.s32 4294967294, %v746_v52 }
 0x126   : > { %v574_v58 = vsel %vm564_vm15, nan, %v573_v36  ;;  %v1927_v35 = vsel %vm564_vm15, nan, %v1926_v15  ;;  %v764_v44 = vsub.s32 4, %v4076_v53  ;;  %vm918_vm10 = vcmp.lt.s32.totalorder %v4086_v31, 3 }
 0x127   : > { %1811 = vst [vmem:[%s4136_s7] sm:$0xff] %v574_v58  ;;  %3176 = vst [vmem:[%s4141_s8] sm:$0xff] %v1927_v35  ;;  %v920_v40 = vsel %vm916_vm6, %v900_v42, %v903_v5  ;;  %v921_v24 = vsel %vm919_vm8, %v909_v47, 2102212464  ;;  %v924_v28 = vsel %vm916_vm6, %v903_v5, %v906_v27  ;;  %v926_v17 = vsel %vm918_vm10, %v909_v47, %v925_v39 }
 0x128   : > { %v3572_v41 = vpop.eup %3571  ;;  %v930_v46 = vsel %vm918_vm10, %v912_v50, %v929_v49  ;;  %vm3346_vm11 = vcmp.lt.s32.totalorder %v3345_v57, 0  ;;  %v785_v3 = vshrl.u32 %v784_v34, 23  ;;  %v922_v50 = vsel %vm918_vm10, %v906_v27, %v921_v24 }
 0x129   : > { %v3574_v43 = vpop.eup %3573  ;;  %v674_v48 = vxor.u32 2147483648, %v3572_v41  ;;  %v931_v45 = vsel %vm917_vm9, %v928_v19, %v930_v46  ;;  %v749_v37 = vsel %vm3346_vm11, 0, %v3345_v57  ;;  %v927_v54 = vsel %vm917_vm9, %v924_v28, %v926_v17  ;;  %v412_v57 = vpop.permute.xlu1 %411 }
 0x12a   : > { %v671_v32 = vxor.u32 2147483648, %v3574_v43  ;;  %v4162_v61 = vmul.u32.u64.low %v4078_v38, %v931_v45  ;;  %v4163_v20 = vmul.u32.u64.high %v4078_v38, %v931_v45, %v4162_v61  ;;  %v750_v63 = vsub.s32 32, %v749_v37 }
 0x12b   : > { %v675_v47 = vsel %vm673_vm0, %v674_v48, %v3574_v43  ;;  %v2029_v56 = vsel %vm2027_vm1, %v674_v48, %v3574_v43  ;;  %v754_v11 = vsub.s32 4294967266, %v749_v37  ;;  %v3347_v27 = vadd.s32 4294967169, %v785_v3 }
 0x12c   : > { %v672_v34 = vsel %vm670_vm2, %v3572_v41, %v671_v32  ;;  %v2026_v51 = vsel %vm2024_vm3, %v3572_v41, %v671_v32  ;;  %v752_v15 = vshrl.u32 %v4084_v30, %v750_v63  ;;  %v751_v35 = vshll.u32 %v4099_v21, %v749_v37 }
 0x12d   : > { %v676_v5 = vsel %vm669_vm4, %v672_v34, %v675_v47  ;;  %v2030_v36 = vsel %vm2023_vm5, %v2026_v51, %v2029_v56  ;;  %v755_v52 = vadd.s32 127, %v754_v11  ;;  %v791_v25 = vadd.s32 1, %v3347_v27 }
 0x12e   : > { %v677_v42 = vsel %vm667_vm7, nan, %v676_v5  ;;  %v2031_v58 = vsel %vm667_vm7, nan, %v2030_v36  ;;  %v4190_v55 = vmul.u32.u64.low %v4078_v38, %v927_v54  ;;  %v4191_v39 = vmul.u32.u64.high %v4078_v38, %v927_v54, %v4190_v55 }
 0x12f   : > { %1812 = vst [vmem:[%s4136_s7 + $0x8] sm:$0xff] %v677_v42  ;;  %3177 = vst [vmem:[%s4141_s8 + $0x8] sm:$0xff] %v2031_v58  ;;  %v452_v30 = vmul.f32 %v3849_v16, %v416_v7  ;;  %v753_v19 = vor.u32 %v752_v15, %v751_v35  ;;  %v756_v49 = vshll.u32 %v755_v52, 23  ;;  %vm680_vm12 = vcmp.lt.s32.totalorder %v3875_v22, 0 }
 0x130   : > { %v923_v33 = vsel %vm917_vm9, %v920_v40, %v922_v50  ;;  %v781_v21 = vand.u32 2147483647, %v4064_v13  ;;  %vm792_vm13 = vcmp.gt.s32.totalorder %v791_v25, 0  ;;  %v765_v24 = vsel %vm680_vm12, %v764_v44, %v4076_v53 }
 0x131   : > { %v757_v41 = vor.u32 4788187, %v756_v49  ;;  %vm941_vm14 = vc.u32 %v4163_v20, %v4190_v55  ;;  %v793_v28 = vsel %vm792_vm13, %v791_v25, 0  ;;  %vm4206_vm15 = vcmp.le.f32.partialorder %v678_v62, 0.7853982 }
 0x132   : > { %v942_v31 = vadd.s32 1, %v4191_v39  ;;  %v795_v40 = vand.u32 31, %v793_v28  ;;  %v4212_v46 = vadd.f32 %v452_v30, %v3838_v60  ;;  %v760_v48 = vcvt.s32.f32 %v753_v19 }
 0x133   : > { %v758_v43 = vand.u32 2147483647, %v757_v41  ;;  %v939_v53 = vmul.u32 %v4078_v38, %v923_v33  ;;  %v4216_v44 = vmul.f32 %v3849_v16, %v412_v57  ;;  %v767_v45 = vsel %vm4206_vm15, 0, %v765_v24 }
 0x134   : > { %v943_v62 = vsel %vm941_vm14, %v942_v31, %v4191_v39  ;;  %v788_v3 = vand.u32 8388607, %v781_v21  ;;  %v796_v32 = vsub.s32 32, %v795_v40  ;;  %v4223_v60 = vshrl.u32 %v793_v28, 5 }
 0x135   : > { %v761_v37 = vmul.f32 %v760_v48, %v758_v43  ;;  %v944_v61 = vadd.s32 %v943_v62, %v939_v53  ;;  %v798_v47 = vshll.u32 %v3718_v0, %v795_v40  ;;  %v801_v56 = vshll.u32 %v3719_v6, %v795_v40 }
 0x136   : > { %v799_v38 = vshrl.u32 %v3719_v6, %v796_v32  ;;  %v802_v63 = vshrl.u32 %v3720_v10, %v796_v32  ;;  %v805_v50 = vshrl.u32 %v3721_v12, %v796_v32  ;;  %v807_v11 = vshll.u32 %v3721_v12, %v795_v40 }
 0x137   : > { %v762_v34 = vxor.u32 2147483648, %v761_v37  ;;  %v945_v51 = vadd.s32 536870912, %v944_v61  ;;  %v808_v54 = vshrl.u32 %v3722_v14, %v796_v32  ;;  %v804_v36 = vshll.u32 %v3720_v10, %v795_v40 }
 0x138   : > { %v800_v7 = vor.u32 %v799_v38, %v798_v47  ;;  %v803_v5 = vor.u32 %v802_v63, %v801_v56  ;;  %v811_v15 = vshrl.u32 %v3723_v29, %v796_v32  ;;  %v2125_v42 = vadd.s32 3, %v767_v45 }
 0x139   : > { %v763_v27 = vsel %vm680_vm12, %v762_v34, %v761_v37  ;;  %v946_v58 = vshrl.u32 %v945_v51, 30  ;;  %v809_v35 = vor.u32 %v808_v54, %v807_v11  ;;  %v789_v39 = vor.u32 8388608, %v788_v3 }
 0x13a   : > { %v766_v52 = vsel %vm4206_vm15, %v3875_v22, %v763_v27  ;;  %v806_v25 = vor.u32 %v805_v50, %v804_v36  ;;  %v810_v30 = vshll.u32 %v3722_v14, %v795_v40  ;;  %v4240_v19 = vand.u32 3, %v767_v45 }
 0x13b   : > { %3575 = vcosq.f32 %v766_v52  ;;  %vm886_vm0 = vcmp.lt.s32.totalorder %v3955_v26, 0  ;;  %v947_v49 = vshll.u32 %v946_v58, 30  ;;  %vm813_vm1 = vcmp.lt.s32.totalorder %v4223_v60, 1 }
 0x13c   : > { %3577 = vsinq.f32 %v766_v52  ;;  %v812_v33 = vor.u32 %v811_v15, %v810_v30  ;;  %vm816_vm2 = vcmp.lt.s32.totalorder %v4223_v60, 4  ;;  %v821_v57 = vsel %vm813_vm1, %v800_v7, %v803_v5 }
 0x13d   : > { %v2126_v41 = vand.u32 3, %v2125_v42  ;;  %v4247_v24 = vsub.s32 %v944_v61, %v947_v49  ;;  %vm815_vm3 = vcmp.lt.s32.totalorder %v4223_v60, 3  ;;  %v822_v28 = vsel %vm816_vm2, %v809_v35, 920167782 }
 0x13e   : > { %vm4254_vm4 = vcmp.le.f32.partialorder %v884_v4, 0.7853982  ;;  %vm814_vm5 = vcmp.lt.s32.totalorder %v4223_v60, 2  ;;  %v823_v31 = vsel %vm815_vm3, %v806_v25, %v822_v28  ;;  %v4261_v40 = vshll.u32 %v789_v39, 8 }
 0x13f   : > { %v1093_v43 = vand.u32 2139095040, %v4212_v46  ;;  %v950_v48 = vsub.s32 0, %v4247_v24  ;;  %v970_v53 = vsub.s32 4, %v946_v58  ;;  %v818_v45 = vsel %vm816_vm2, %v806_v25, 2102212464 }
 0x140   : > { %v824_v4 = vsel %vm814_vm5, %v821_v57, %v823_v31  ;;  %v825_v62 = vsel %vm813_vm1, %v803_v5, %v806_v25  ;;  %v826_v3 = vsel %vm816_vm2, %v812_v33, 1326507024  ;;  %vm772_vm6 = vcmp.lt.s32.totalorder %v4240_v19, 2 }
 0x141   : > { %v4274_v37 = vmul.u32.u64.low %v4261_v40, %v824_v4  ;;  %v4275_v61 = vmul.u32.u64.high %v4261_v40, %v824_v4, %v4274_v37  ;;  %vm773_vm7 = vcmp.eq.s32.totalorder %v4240_v19, 0  ;;  %v3352_v47 = vmin.u32 %v950_v48, %v4247_v24 }
 0x142   : > { %v797_v38 = vshrl.u32 %v3718_v0, %v796_v32  ;;  %vm770_vm8 = vweird.f32 %v3875_v22  ;;  %vm776_vm9 = vcmp.eq.s32.totalorder %v4240_v19, 2  ;;  %v827_v56 = vsel %vm815_vm3, %v809_v35, %v826_v3 }
 0x143   : > { %v1090_v63 = vand.u32 2147483647, %v4212_v46  ;;  %v1094_v50 = vshrl.u32 %v1093_v43, 23  ;;  %v952_v34 = vclz %v3352_v47  ;;  %v819_v11 = vsel %vm815_vm3, %v803_v5, %v818_v45 }
 0x144   : > { %v817_v51 = vsel %vm813_vm1, %v797_v38, %v800_v7  ;;  %v828_v32 = vsel %vm814_vm5, %v825_v62, %v827_v56  ;;  %vm2127_vm10 = vcmp.lt.s32.totalorder %v2126_v41, 2  ;;  %vm2128_vm11 = vcmp.eq.s32.totalorder %v2126_v41, 0 }
 0x145   : > { %vm2131_vm12 = vcmp.eq.s32.totalorder %v2126_v41, 2  ;;  %v971_v54 = vsel %vm886_vm0, %v970_v53, %v946_v58  ;;  %v3576_v36 = vpop.eup %3575  ;;  %v3353_v15 = vadd.s32 4294967294, %v952_v34  ;;  %v3359_v35 = vadd.s32 4294967169, %v1094_v50 }
 0x146   : > { %v4296_v27 = vmul.u32.u64.low %v4261_v40, %v828_v32  ;;  %v4297_v42 = vmul.u32.u64.high %v4261_v40, %v828_v32, %v4296_v27  ;;  %v3578_v7 = vpop.eup %3577  ;;  %v777_v52 = vxor.u32 2147483648, %v3576_v36  ;;  %v940_v5 = vadd.s32 %v4190_v55, %v4163_v20  ;;  %v424_v32 = vpop.permute.xlu0 %423 }
 0x147   : > { %v820_v39 = vsel %vm814_vm5, %v817_v51, %v819_v11  ;;  %v1097_v25 = vand.u32 8388607, %v1090_v63  ;;  %v774_v30 = vxor.u32 2147483648, %v3578_v7  ;;  %vm3354_vm13 = vcmp.lt.s32.totalorder %v3353_v15, 0 }
 0x148   : > { %v973_v58 = vsel %vm4254_vm4, 0, %v971_v54  ;;  %v839_v49 = vadd.s32 1, %v4275_v61  ;;  %v778_v33 = vsel %vm776_vm9, %v777_v52, %v3578_v7  ;;  %v2133_v57 = vsel %vm2131_vm12, %v777_v52, %v3578_v7 }
 0x149   : > { %v955_v20 = vsel %vm3354_vm13, 0, %v3353_v15  ;;  %v1100_v55 = vadd.s32 1, %v3359_v35  ;;  %v775_v60 = vsel %vm773_vm7, %v3576_v36, %v774_v30  ;;  %v2130_v28 = vsel %vm2128_vm11, %v3576_v36, %v774_v30 }
 0x14a   : > { %v956_v31 = vsub.s32 32, %v955_v20  ;;  %v836_v43 = vmul.u32 %v4261_v40, %v820_v39  ;;  %v779_v48 = vsel %vm772_vm6, %v775_v60, %v778_v33  ;;  %v2134_v53 = vsel %vm2127_vm10, %v2130_v28, %v2133_v57 }
 0x14b   : > { %v960_v45 = vsub.s32 4294967266, %v955_v20  ;;  %v4320_v4 = vadd.f32 %v4216_v44, %v3836_v59  ;;  %v780_v62 = vsel %vm770_vm8, nan, %v779_v48  ;;  %v2135_v3 = vsel %vm770_vm8, nan, %v2134_v53 }
 0x14c   : > { %v958_v47 = vshrl.u32 %v940_v5, %v956_v31  ;;  %vm838_vm14 = vc.u32 %v4297_v42, %v4274_v37  ;;  %1813 = vst [vmem:[%s4136_s7 + $0x10] sm:$0xff] %v780_v62  ;;  %3178 = vst [vmem:[%s4141_s8 + $0x10] sm:$0xff] %v2135_v3  ;;  %v957_v19 = vshll.u32 %v4247_v24, %v955_v20  ;;  %vm1101_vm15 = vcmp.gt.s32.totalorder %v1100_v55, 0 }
 0x14d   : > { %v961_v41 = vadd.s32 127, %v960_v45  ;;  %v840_v40 = vsel %vm838_vm14, %v839_v49, %v4275_v61  ;;  %v1102_v44 = vsel %vm1101_vm15, %v1100_v55, 0  ;;  %v2333_v50 = vadd.s32 3, %v973_v58 }
 0x14e   : > { %v841_v59 = vadd.s32 %v840_v40, %v836_v43  ;;  %v959_v38 = vor.u32 %v958_v47, %v957_v19  ;;  %v1104_v34 = vand.u32 31, %v1102_v44  ;;  %v1098_v51 = vor.u32 8388608, %v1097_v25 }
 0x14f   : > { %v962_v56 = vshll.u32 %v961_v41, 23  ;;  %v990_v11 = vand.u32 2139095040, %v4320_v4  ;;  %v4333_v15 = vand.u32 3, %v973_v58  ;;  %v987_v61 = vand.u32 2147483647, %v4320_v4 }
 0x150   : > { %v842_v22 = vadd.s32 536870912, %v841_v59  ;;  %v1105_v36 = vsub.s32 32, %v1104_v34  ;;  %v966_v35 = vcvt.s32.f32 %v959_v38  ;;  %v4338_v7 = vand.u32 3, %v2333_v50 }
 0x151   : > { %v963_v54 = vor.u32 4788187, %v962_v56  ;;  %v4341_v52 = vmul.f32 %v3849_v16, %v424_v32  ;;  %v4345_v5 = vadd.s32 %v4274_v37, %v4297_v42  ;;  %v4348_v25 = vshll.u32 %v1098_v51, 8 }
 0x152   : > { %v4335_v24 = vshrl.u32 %v842_v22, 30  ;;  %v991_v30 = vshrl.u32 %v990_v11, 23  ;;  %v1108_v49 = vshrl.u32 %v3719_v6, %v1105_v36  ;;  %v1111_v33 = vshrl.u32 %v3720_v10, %v1105_v36 }
 0x153   : > { %v964_v27 = vand.u32 2147483647, %v963_v54  ;;  %v1114_v57 = vshrl.u32 %v3721_v12, %v1105_v36  ;;  %v1117_v55 = vshrl.u32 %v3722_v14, %v1105_v36  ;;  %v1120_v60 = vshrl.u32 %v3723_v29, %v1105_v36 }
 0x154   : > { %v844_v39 = vshll.u32 %v4335_v24, 30  ;;  %v4359_v37 = vand.u32 8388607, %v987_v61  ;;  %v1107_v28 = vshll.u32 %v3718_v0, %v1104_v34  ;;  %v1110_v31 = vshll.u32 %v3719_v6, %v1104_v34 }
 0x155   : > { %v967_v58 = vmul.f32 %v966_v35, %v964_v27  ;;  %v1113_v43 = vshll.u32 %v3720_v10, %v1104_v34  ;;  %v1103_v53 = vshrl.u32 %v1102_v44, 5  ;;  %v1116_v45 = vshll.u32 %v3721_v12, %v1104_v34 }
 0x156   : > { %v4353_v20 = vsub.s32 %v841_v59, %v844_v39  ;;  %v1119_v62 = vshll.u32 %v3722_v14, %v1104_v34  ;;  %vm783_vm1 = vcmp.lt.s32.totalorder %v4064_v13, 0  ;;  %v1109_v47 = vor.u32 %v1108_v49, %v1107_v28 }
 0x157   : > { %v968_v42 = vxor.u32 2147483648, %v967_v58  ;;  %v1112_v19 = vor.u32 %v1111_v33, %v1110_v31  ;;  %v1115_v41 = vor.u32 %v1114_v57, %v1113_v43  ;;  %v1118_v38 = vor.u32 %v1117_v55, %v1116_v45 }
 0x158   : > { %v847_v48 = vsub.s32 0, %v4353_v20  ;;  %v1121_v44 = vor.u32 %v1120_v60, %v1119_v62  ;;  %v867_v56 = vsub.s32 4, %v4335_v24  ;;  %v1106_v50 = vshrl.u32 %v3718_v0, %v1105_v36 }
 0x159   : > { %v969_v3 = vsel %vm886_vm0, %v968_v42, %v967_v58  ;;  %v3355_v34 = vadd.s32 4294967169, %v991_v30  ;;  %vm4378_vm0 = vcmp.le.f32.partialorder %v781_v21, 0.7853982  ;;  %vm1122_vm2 = vcmp.lt.s32.totalorder %v1103_v53, 1 }
 0x15a   : > { %v972_v40 = vsel %vm4254_vm4, %v3955_v26, %v969_v3  ;;  %v3348_v59 = vmin.u32 %v847_v48, %v4353_v20  ;;  %vm1125_vm3 = vcmp.lt.s32.totalorder %v1103_v53, 4  ;;  %vm1123_vm4 = vcmp.lt.s32.totalorder %v1103_v53, 2 }
 0x15b   : > { %3579 = vcosq.f32 %v972_v40  ;;  %vm1124_vm5 = vcmp.lt.s32.totalorder %v1103_v53, 3  ;;  %v1127_v17 = vsel %vm1125_vm3, %v1115_v41, 2102212464  ;;  %v1130_v11 = vsel %vm1122_vm2, %v1109_v47, %v1112_v19 }
 0x15c   : > { %3581 = vsinq.f32 %v972_v40  ;;  %v849_v51 = vclz %v3348_v59  ;;  %v1131_v54 = vsel %vm1125_vm3, %v1118_v38, 920167782  ;;  %v1134_v27 = vsel %vm1122_vm2, %v1112_v19, %v1115_v41 }
 0x15d   : > { %v1135_v35 = vsel %vm1125_vm3, %v1121_v44, 1326507024  ;;  %vm982_vm6 = vcmp.eq.s32.totalorder %v4333_v15, 2  ;;  %v1126_v36 = vsel %vm1122_vm2, %v1106_v50, %v1109_v47  ;;  %v1132_v39 = vsel %vm1124_vm5, %v1115_v41, %v1131_v54 }
 0x15e   : > { %v3349_v32 = vadd.s32 4294967294, %v849_v51  ;;  %v1136_v30 = vsel %vm1124_vm5, %v1118_v38, %v1135_v35  ;;  %v997_v21 = vadd.s32 1, %v3355_v34  ;;  %vm979_vm7 = vcmp.eq.s32.totalorder %v4333_v15, 0 }
 0x15f   : > { %v1128_v58 = vsel %vm1124_vm5, %v1112_v19, %v1127_v17  ;;  %v1133_v49 = vsel %vm1123_vm4, %v1130_v11, %v1132_v39  ;;  %v1137_v33 = vsel %vm1123_vm4, %v1134_v27, %v1136_v30  ;;  %vm978_vm9 = vcmp.lt.s32.totalorder %v4333_v15, 2 }
 0x160   : > { %vm3350_vm8 = vcmp.lt.s32.totalorder %v3349_v32, 0  ;;  %vm2335_vm10 = vcmp.lt.s32.totalorder %v4338_v7, 2  ;;  %v4389_v55 = vmul.u32.u64.low %v4348_v25, %v1137_v33  ;;  %v4390_v60 = vmul.u32.u64.high %v4348_v25, %v1137_v33, %v4389_v55 }
 0x161   : > { %v852_v57 = vsel %vm3350_vm8, 0, %v3349_v32  ;;  %vm998_vm11 = vcmp.gt.s32.totalorder %v997_v21, 0  ;;  %vm976_vm12 = vweird.f32 %v3955_v26  ;;  %v868_v31 = vsel %vm783_vm1, %v867_v56, %v4335_v24 }
 0x162   : > { %v853_v42 = vsub.s32 32, %v852_v57  ;;  %v857_v28 = vsub.s32 4294967266, %v852_v57  ;;  %v999_v43 = vsel %vm998_vm11, %v997_v21, 0  ;;  %vm2336_vm13 = vcmp.eq.s32.totalorder %v4338_v7, 0 }
 0x163   : > { %v4398_v48 = vmul.u32.u64.low %v4348_v25, %v1133_v49  ;;  %v4399_v45 = vmul.u32.u64.high %v4348_v25, %v1133_v49, %v4398_v48  ;;  %v1001_v62 = vand.u32 31, %v999_v43  ;;  %v854_v3 = vshll.u32 %v4353_v20, %v852_v57 }
 0x164   : > { %v855_v47 = vshrl.u32 %v4345_v5, %v853_v42  ;;  %v858_v19 = vadd.s32 127, %v857_v28  ;;  %v1129_v41 = vsel %vm1123_vm4, %v1126_v36, %v1128_v58  ;;  %vm2339_vm14 = vcmp.eq.s32.totalorder %v4338_v7, 2 }
 0x165   : > { %v3580_v40 = vpop.eup %3579  ;;  %v870_v24 = vsel %vm4378_vm0, 0, %v868_v31  ;;  %v995_v59 = vor.u32 8388608, %v4359_v37  ;;  %v1002_v38 = vsub.s32 32, %v1001_v62  ;;  %vm1147_vm15 = vc.u32 %v4390_v60, %v4398_v48 }
 0x166   : > { %v3582_v44 = vpop.eup %3581  ;;  %v983_v56 = vxor.u32 2147483648, %v3580_v40  ;;  %v856_v50 = vor.u32 %v855_v47, %v854_v3  ;;  %v859_v34 = vshll.u32 %v858_v19, 23  ;;  %v1145_v20 = vmul.u32 %v4348_v25, %v1129_v41 }
 0x167   : > { %v980_v5 = vxor.u32 2147483648, %v3582_v44  ;;  %v1148_v53 = vadd.s32 1, %v4399_v45  ;;  %v4413_v51 = vshrl.u32 %v999_v43, 5  ;;  %v1005_v32 = vshrl.u32 %v3719_v6, %v1002_v38 }
 0x168   : > { %v984_v17 = vsel %vm982_vm6, %v983_v56, %v3582_v44  ;;  %v2341_v37 = vsel %vm2339_vm14, %v983_v56, %v3582_v44  ;;  %v860_v11 = vor.u32 4788187, %v859_v34  ;;  %v863_v25 = vcvt.s32.f32 %v856_v50 }
 0x169   : > { %v981_v54 = vsel %vm979_vm7, %v3580_v40, %v980_v5  ;;  %v2338_v27 = vsel %vm2336_vm13, %v3580_v40, %v980_v5  ;;  %v1149_v35 = vsel %vm1147_vm15, %v1148_v53, %v4399_v45  ;;  %v1004_v33 = vshll.u32 %v3718_v0, %v1001_v62 }
 0x16a   : > { %v985_v36 = vsel %vm978_vm9, %v981_v54, %v984_v17  ;;  %v2342_v39 = vsel %vm2335_vm10, %v2338_v27, %v2341_v37  ;;  %v861_v30 = vand.u32 2147483647, %v860_v11  ;;  %v1150_v21 = vadd.s32 %v1149_v35, %v1145_v20 }
 0x16b   : > { %v986_v58 = vsel %vm976_vm12, nan, %v985_v36  ;;  %v2343_v49 = vsel %vm976_vm12, nan, %v2342_v39  ;;  %v1008_v57 = vshrl.u32 %v3720_v10, %v1002_v38  ;;  %v1007_v42 = vshll.u32 %v3719_v6, %v1001_v62 }
 0x16c   : > { %1815 = vst [vmem:[%s4136_s7 + $0x20] sm:$0xff] %v986_v58  ;;  %3180 = vst [vmem:[%s4141_s8 + $0x20] sm:$0xff] %v2343_v49  ;;  %v864_v55 = vmul.f32 %v863_v25, %v861_v30  ;;  %v1151_v15 = vadd.s32 536870912, %v1150_v21  ;;  %v1011_v7 = vshrl.u32 %v3721_v12, %v1002_v38  ;;  %v1010_v28 = vshll.u32 %v3720_v10, %v1001_v62 }
 0x16d   : > { %v1013_v31 = vshll.u32 %v3721_v12, %v1001_v62  ;;  %v1014_v43 = vshrl.u32 %v3722_v14, %v1002_v38  ;;  %v1017_v26 = vshrl.u32 %v3723_v29, %v1002_v38  ;;  %v1006_v47 = vor.u32 %v1005_v32, %v1004_v33 }
 0x16e   : > { %v865_v45 = vxor.u32 2147483648, %v864_v55  ;;  %v1152_v3 = vshrl.u32 %v1151_v15, 30  ;;  %v1009_v19 = vor.u32 %v1008_v57, %v1007_v42  ;;  %v4441_v41 = vand.u32 3, %v870_v24 }
 0x16f   : > { %v1012_v40 = vor.u32 %v1011_v7, %v1010_v28  ;;  %v1015_v44 = vor.u32 %v1014_v43, %v1013_v31  ;;  %v1016_v56 = vshll.u32 %v3722_v14, %v1001_v62  ;;  %v2229_v34 = vadd.s32 3, %v870_v24 }
 0x170   : > { %v866_v50 = vsel %vm783_vm1, %v865_v45, %v864_v55  ;;  %v1153_v5 = vshll.u32 %v1152_v3, 30  ;;  %v4446_v20 = vshll.u32 %v995_v59, 8  ;;  %vm1019_vm2 = vcmp.lt.s32.totalorder %v4413_v51, 1 }
 0x171   : > { %v869_v53 = vsel %vm4378_vm0, %v4064_v13, %v866_v50  ;;  %v1018_v17 = vor.u32 %v1017_v26, %v1016_v56  ;;  %v4454_v37 = vadd.f32 %v4341_v52, %v3842_v2  ;;  %vm1022_vm1 = vcmp.lt.s32.totalorder %v4413_v51, 4 }
 0x172   : > { %3583 = vcosq.f32 %v869_v53  ;;  %v4456_v62 = vsub.s32 %v1150_v21, %v1153_v5  ;;  %v1027_v24 = vsel %vm1019_vm2, %v1006_v47, %v1009_v19  ;;  %vm1021_vm3 = vcmp.lt.s32.totalorder %v4413_v51, 3 }
 0x173   : > { %3585 = vsinq.f32 %v869_v53  ;;  %v1024_v22 = vsel %vm1022_vm1, %v1012_v40, 2102212464  ;;  %v1028_v59 = vsel %vm1022_vm1, %v1015_v44, 920167782  ;;  %v1003_v32 = vshrl.u32 %v3718_v0, %v1002_v38 }
 0x174   : > { %v1156_v11 = vsub.s32 0, %v4456_v62  ;;  %vm1020_vm0 = vcmp.lt.s32.totalorder %v4413_v51, 2  ;;  %v1029_v2 = vsel %vm1021_vm3, %v1012_v40, %v1028_v59  ;;  %v1176_v52 = vsub.s32 4, %v1152_v3 }
 0x175   : > { %v1030_v54 = vsel %vm1020_vm0, %v1027_v24, %v1029_v2  ;;  %v1031_v27 = vsel %vm1019_vm2, %v1009_v19, %v1012_v40  ;;  %v1032_v25 = vsel %vm1022_vm1, %v1018_v17, 1326507024  ;;  %vm4473_vm4 = vcmp.le.f32.partialorder %v1090_v63, 0.7853982 }
 0x176   : > { %v3360_v38 = vmin.u32 %v1156_v11, %v4456_v62  ;;  %v1023_v36 = vsel %vm1019_vm2, %v1003_v32, %v1006_v47  ;;  %v1025_v39 = vsel %vm1021_vm3, %v1009_v19, %v1024_v22  ;;  %v2230_v30 = vand.u32 3, %v2229_v34 }
 0x177   : > { %v1033_v21 = vsel %vm1021_vm3, %v1015_v44, %v1032_v25  ;;  %v4485_v58 = vmul.u32.u64.low %v4446_v20, %v1030_v54  ;;  %v4486_v49 = vmul.u32.u64.high %v4446_v20, %v1030_v54, %v4485_v58  ;;  %vm875_vm5 = vcmp.lt.s32.totalorder %v4441_v41, 2  ;;  %v420_v25 = vpop.permute.xlu1 %419 }
 0x178   : > { %vm1092_vm6 = vcmp.lt.s32.totalorder %v4212_v46, 0  ;;  %v1158_v63 = vclz %v3360_v38  ;;  %v1034_v33 = vsel %vm1020_vm0, %v1031_v27, %v1033_v21  ;;  %vm873_vm7 = vweird.f32 %v4064_v13 }
 0x179   : > { %vm876_vm8 = vcmp.eq.s32.totalorder %v4441_v41, 0  ;;  %v1177_v57 = vsel %vm1092_vm6, %v1176_v52, %v1152_v3  ;;  %v1026_v55 = vsel %vm1020_vm0, %v1023_v36, %v1025_v39  ;;  %v1299_v15 = vand.u32 2139095040, %v4454_v37 }
 0x17a   : > { %vm879_vm9 = vcmp.eq.s32.totalorder %v4441_v41, 2  ;;  %v3361_v42 = vadd.s32 4294967294, %v1158_v63  ;;  %v4502_v7 = vmul.u32.u64.low %v4446_v20, %v1034_v33  ;;  %v4503_v28 = vmul.u32.u64.high %v4446_v20, %v1034_v33, %v4502_v7 }
 0x17b   : > { %vm2231_vm10 = vcmp.lt.s32.totalorder %v2230_v30, 2  ;;  %vm2232_vm11 = vcmp.eq.s32.totalorder %v2230_v30, 0  ;;  %vm2235_vm12 = vcmp.eq.s32.totalorder %v2230_v30, 2  ;;  %v1300_v31 = vshrl.u32 %v1299_v15, 23 }
 0x17c   : > { %v3584_v43 = vpop.eup %3583  ;;  %v1146_v26 = vadd.s32 %v4398_v48, %v4390_v60  ;;  %vm3362_vm13 = vcmp.lt.s32.totalorder %v3361_v42, 0  ;;  %v1179_v51 = vsel %vm4473_vm4, 0, %v1177_v57  ;;  %v1042_v45 = vmul.u32 %v4446_v20, %v1026_v55  ;;  %v432_v57 = vpop.permute.xlu0 %431 }
 0x17d   : > { %v3586_v3 = vpop.eup %3585  ;;  %v880_v47 = vxor.u32 2147483648, %v3584_v43  ;;  %v1161_v19 = vsel %vm3362_vm13, 0, %v3361_v42  ;;  %v1045_v40 = vadd.s32 1, %v4486_v49  ;;  %v3367_v44 = vadd.s32 4294967169, %v1300_v31 }
 0x17e   : > { %v877_v56 = vxor.u32 2147483648, %v3586_v3  ;;  %v1162_v50 = vsub.s32 32, %v1161_v19  ;;  %v1166_v34 = vsub.s32 4294967266, %v1161_v19  ;;  %v1296_v5 = vand.u32 2147483647, %v4454_v37 }
 0x17f   : > { %v881_v60 = vsel %vm879_vm9, %v880_v47, %v3586_v3  ;;  %v2237_v48 = vsel %vm2235_vm12, %v880_v47, %v3586_v3  ;;  %v1163_v53 = vshll.u32 %v4456_v62, %v1161_v19  ;;  %vm1044_vm14 = vc.u32 %v4503_v28, %v4485_v58 }
 0x180   : > { %v878_v20 = vsel %vm876_vm8, %v3584_v43, %v877_v56  ;;  %v2234_v17 = vsel %vm2232_vm11, %v3584_v43, %v877_v56  ;;  %v1164_v24 = vshrl.u32 %v1146_v26, %v1162_v50  ;;  %v1167_v22 = vadd.s32 127, %v1166_v34 }
 0x181   : > { %v882_v59 = vsel %vm875_vm5, %v878_v20, %v881_v60  ;;  %v2238_v11 = vsel %vm2231_vm10, %v2234_v17, %v2237_v48  ;;  %v1046_v32 = vsel %vm1044_vm14, %v1045_v40, %v4486_v49  ;;  %v1306_v2 = vadd.s32 1, %v3367_v44 }
 0x182   : > { %v883_v62 = vsel %vm873_vm7, nan, %v882_v59  ;;  %v2239_v52 = vsel %vm873_vm7, nan, %v2238_v11  ;;  %v1165_v54 = vor.u32 %v1164_v24, %v1163_v53  ;;  %v1168_v27 = vshll.u32 %v1167_v22, 23 }
 0x183   : > { %1814 = vst [vmem:[%s4136_s7 + $0x18] sm:$0xff] %v883_v62  ;;  %3179 = vst [vmem:[%s4141_s8 + $0x18] sm:$0xff] %v2239_v52  ;;  %v1047_v38 = vadd.s32 %v1046_v32, %v1042_v45  ;;  %vm1307_vm15 = vcmp.gt.s32.totalorder %v1306_v2, 0  ;;  %v2541_v36 = vadd.s32 3, %v1179_v51  ;;  %v1303_v21 = vand.u32 8388607, %v1296_v5 }
 0x184   : > { %v1169_v41 = vor.u32 4788187, %v1168_v27  ;;  %v1308_v39 = vsel %vm1307_vm15, %v1306_v2, 0  ;;  %v453_v63 = vmul.f32 %v3849_v16, %v420_v25  ;;  %v1172_v13 = vcvt.s32.f32 %v1165_v54 }
 0x185   : > { %v1048_v30 = vadd.s32 536870912, %v1047_v38  ;;  %v1310_v49 = vand.u32 31, %v1308_v39  ;;  %v4534_v7 = vand.u32 3, %v1179_v51  ;;  %v4536_v31 = vand.u32 3, %v2541_v36 }
 0x186   : > { %v1170_v33 = vand.u32 2147483647, %v1169_v41  ;;  %vm989_vm2 = vcmp.lt.s32.totalorder %v4320_v4, 0  ;;  %v1304_v26 = vor.u32 8388608, %v1303_v21  ;;  %v4540_v45 = vadd.f32 %v453_v63, %v3840_v1 }
 0x187   : > { %v1049_v55 = vshrl.u32 %v1048_v30, 30  ;;  %v1311_v15 = vsub.s32 32, %v1310_v49  ;;  %v4543_v3 = vmul.f32 %v3849_v16, %v432_v57  ;;  %v4545_v19 = vshrl.u32 %v1308_v39, 5 }
 0x188   : > { %v1173_v42 = vmul.f32 %v1172_v13, %v1170_v33  ;;  %v1313_v56 = vshll.u32 %v3718_v0, %v1310_v49  ;;  %v1316_v60 = vshll.u32 %v3719_v6, %v1310_v49  ;;  %v1319_v48 = vshll.u32 %v3720_v10, %v1310_v49 }
 0x189   : > { %v1050_v43 = vshll.u32 %v1049_v55, 30  ;;  %v1314_v40 = vshrl.u32 %v3719_v6, %v1311_v15  ;;  %v1317_v51 = vshrl.u32 %v3720_v10, %v1311_v15  ;;  %v1320_v50 = vshrl.u32 %v3721_v12, %v1311_v15 }
 0x18a   : > { %v1174_v47 = vxor.u32 2147483648, %v1173_v42  ;;  %v1323_v34 = vshrl.u32 %v3722_v14, %v1311_v15  ;;  %v1326_v53 = vshrl.u32 %v3723_v29, %v1311_v15  ;;  %v1322_v24 = vshll.u32 %v3721_v12, %v1310_v49 }
 0x18b   : > { %v4549_v44 = vsub.s32 %v1047_v38, %v1050_v43  ;;  %v1325_v22 = vshll.u32 %v3722_v14, %v1310_v49  ;;  %v1073_v59 = vsub.s32 4, %v1049_v55  ;;  %v1315_v11 = vor.u32 %v1314_v40, %v1313_v56 }
 0x18c   : > { %v1175_v1 = vsel %vm1092_vm6, %v1174_v47, %v1173_v42  ;;  %v1318_v32 = vor.u32 %v1317_v51, %v1316_v60  ;;  %vm4567_vm1 = vcmp.le.f32.partialorder %v987_v61, 0.7853982  ;;  %v1321_v62 = vor.u32 %v1320_v50, %v1319_v48 }
 0x18d   : > { %v1178_v20 = vsel %vm4473_vm4, %v4212_v46, %v1175_v1  ;;  %v1053_v17 = vsub.s32 0, %v4549_v44  ;;  %v1324_v52 = vor.u32 %v1323_v34, %v1322_v24  ;;  %v1043_v54 = vadd.s32 %v4485_v58, %v4503_v28 }
 0x18e   : > { %3587 = vcosq.f32 %v1178_v20  ;;  %v1327_v27 = vor.u32 %v1326_v53, %v1325_v22  ;;  %v4574_v25 = vshll.u32 %v1304_v26, 8  ;;  %v1196_v38 = vand.u32 2139095040, %v4540_v45 }
 0x18f   : > { %3589 = vsinq.f32 %v1178_v20  ;;  %v3356_v35 = vmin.u32 %v1053_v17, %v4549_v44  ;;  %v1312_v36 = vshrl.u32 %v3718_v0, %v1311_v15  ;;  %vm1328_vm3 = vcmp.lt.s32.totalorder %v4545_v19, 1 }
 0x190   : > { %v1193_v61 = vand.u32 2147483647, %v4540_v45  ;;  %vm1188_vm0 = vcmp.eq.s32.totalorder %v4534_v7, 2  ;;  %vm2547_vm4 = vcmp.eq.s32.totalorder %v4536_v31, 2  ;;  %v1074_v39 = vsel %vm989_vm2, %v1073_v59, %v1049_v55 }
 0x191   : > { %v1055_v41 = vclz %v3356_v35  ;;  %vm1329_vm5 = vcmp.lt.s32.totalorder %v4545_v19, 2  ;;  %vm1331_vm6 = vcmp.lt.s32.totalorder %v4545_v19, 4  ;;  %v1336_v58 = vsel %vm1328_vm3, %v1315_v11, %v1318_v32 }
 0x192   : > { %vm1185_vm7 = vcmp.eq.s32.totalorder %v4534_v7, 0  ;;  %vm2544_vm8 = vcmp.eq.s32.totalorder %v4536_v31, 0  ;;  %vm1330_vm9 = vcmp.lt.s32.totalorder %v4545_v19, 3  ;;  %v1337_v30 = vsel %vm1331_vm6, %v1324_v52, 920167782 }
 0x193   : > { %v3357_v28 = vadd.s32 4294967294, %v1055_v41  ;;  %v1340_v21 = vsel %vm1328_vm3, %v1318_v32, %v1321_v62  ;;  %vm1184_vm10 = vcmp.lt.s32.totalorder %v4534_v7, 2  ;;  %vm2543_vm11 = vcmp.lt.s32.totalorder %v4536_v31, 2 }
 0x194   : > { %v1333_v49 = vsel %vm1331_vm6, %v1321_v62, 2102212464  ;;  %v1338_v63 = vsel %vm1330_vm9, %v1321_v62, %v1337_v30  ;;  %v1341_v33 = vsel %vm1331_vm6, %v1327_v27, 1326507024  ;;  %v1197_v13 = vshrl.u32 %v1196_v38, 23 }
 0x195   : > { %vm1182_vm12 = vweird.f32 %v4212_v46  ;;  %vm3358_vm13 = vcmp.lt.s32.totalorder %v3357_v28, 0  ;;  %v1332_v57 = vsel %vm1328_vm3, %v1312_v36, %v1315_v11  ;;  %v1339_v55 = vsel %vm1329_vm5, %v1336_v58, %v1338_v63 }
 0x196   : > { %v1342_v15 = vsel %vm1330_vm9, %v1324_v52, %v1341_v33  ;;  %v1058_v42 = vsel %vm3358_vm13, 0, %v3357_v28  ;;  %v4607_v26 = vmul.u32.u64.low %v4574_v25, %v1339_v55  ;;  %v4608_v47 = vmul.u32.u64.high %v4574_v25, %v1339_v55, %v4607_v26 }
 0x197   : > { %v1343_v43 = vsel %vm1329_vm5, %v1340_v21, %v1342_v15  ;;  %v1059_v40 = vsub.s32 32, %v1058_v42  ;;  %v1063_v51 = vsub.s32 4294967266, %v1058_v42  ;;  %v1334_v56 = vsel %vm1330_vm9, %v1318_v32, %v1333_v49 }
 0x198   : > { %v3363_v50 = vadd.s32 4294967169, %v1197_v13  ;;  %v3588_v34 = vpop.eup %3587  ;;  %v1076_v1 = vsel %vm4567_vm1, 0, %v1074_v39  ;;  %v4616_v60 = vmul.u32.u64.low %v4574_v25, %v1343_v43  ;;  %v4617_v48 = vmul.u32.u64.high %v4574_v25, %v1343_v43, %v4616_v60 }
 0x199   : > { %v4621_v53 = vand.u32 8388607, %v1193_v61  ;;  %v3590_v20 = vpop.eup %3589  ;;  %v1189_v17 = vxor.u32 2147483648, %v3588_v34  ;;  %v1060_v24 = vshll.u32 %v4549_v44, %v1058_v42  ;;  %v1061_v22 = vshrl.u32 %v1043_v54, %v1059_v40 }
 0x19a   : > { %v1064_v59 = vadd.s32 127, %v1063_v51  ;;  %v1186_v11 = vxor.u32 2147483648, %v3590_v20  ;;  %v1335_v32 = vsel %vm1329_vm5, %v1332_v57, %v1334_v56  ;;  %v1354_v35 = vadd.s32 1, %v4608_v47 }
 0x19b   : > { %v1203_v62 = vadd.s32 1, %v3363_v50  ;;  %v1190_v52 = vsel %vm1188_vm0, %v1189_v17, %v3590_v20  ;;  %v2549_v27 = vsel %vm2547_vm4, %v1189_v17, %v3590_v20  ;;  %v1062_v38 = vor.u32 %v1061_v22, %v1060_v24 }
 0x19c   : > { %v1065_v41 = vshll.u32 %v1064_v59, 23  ;;  %v1187_v44 = vsel %vm1185_vm7, %v3588_v34, %v1186_v11  ;;  %v2546_v19 = vsel %vm2544_vm8, %v3588_v34, %v1186_v11  ;;  %v2437_v54 = vadd.s32 3, %v1076_v1 }
 0x19d   : > { %vm1353_vm14 = vc.u32 %v4617_v48, %v4607_v26  ;;  %v1191_v36 = vsel %vm1184_vm10, %v1187_v44, %v1190_v52  ;;  %v2550_v39 = vsel %vm2543_vm11, %v2546_v19, %v2549_v27  ;;  %v1351_v28 = vmul.u32 %v4574_v25, %v1335_v32 }
 0x19e   : > { %v1066_v58 = vor.u32 4788187, %v1065_v41  ;;  %v1192_v30 = vsel %vm1182_vm12, nan, %v1191_v36  ;;  %v2551_v21 = vsel %vm1182_vm12, nan, %v2550_v39  ;;  %v1355_v49 = vsel %vm1353_vm14, %v1354_v35, %v4608_v47 }
 0x19f   : > { %vm1204_vm15 = vcmp.gt.s32.totalorder %v1203_v62, 0  ;;  %1817 = vst [vmem:[%s4136_s7 + $0x30] sm:$0xff] %v1192_v30  ;;  %3182 = vst [vmem:[%s4141_s8 + $0x30] sm:$0xff] %v2551_v21  ;;  %v1069_v7 = vcvt.s32.f32 %v1062_v38  ;;  %v1356_v33 = vadd.s32 %v1355_v49, %v1351_v28  ;;  %v4649_v15 = vand.u32 3, %v1076_v1 }
 0x1a0   : > { %v1067_v63 = vand.u32 2147483647, %v1066_v58  ;;  %v1205_v13 = vsel %vm1204_vm15, %v1203_v62, 0  ;;  %v4651_v25 = vand.u32 3, %v2437_v54  ;;  %v1201_v40 = vor.u32 8388608, %v4621_v53 }
 0x1a1   : > { %v1207_v31 = vand.u32 31, %v1205_v13  ;;  %v1357_v55 = vadd.s32 536870912, %v1356_v33  ;;  %v4656_v47 = vadd.f32 %v4543_v3, %v3847_v9  ;;  %v1206_v3 = vshrl.u32 %v1205_v13, 5 }
 0x1a2   : > { %v1070_v57 = vmul.f32 %v1069_v7, %v1067_v63  ;;  %v4684_v44 = vshll.u32 %v1201_v40, 8  ;;  %vm1085_vm3 = vcmp.eq.s32.totalorder %v4649_v15, 2  ;;  %vm2443_vm0 = vcmp.eq.s32.totalorder %v4651_v25, 2 }
 0x1a3   : > { %v1208_v42 = vsub.s32 32, %v1207_v31  ;;  %v1358_v46 = vshrl.u32 %v1357_v55, 30  ;;  %v1210_v51 = vshll.u32 %v3718_v0, %v1207_v31  ;;  %v1213_v20 = vshll.u32 %v3719_v6, %v1207_v31 }
 0x1a4   : > { %v1071_v43 = vxor.u32 2147483648, %v1070_v57  ;;  %v1216_v17 = vshll.u32 %v3720_v10, %v1207_v31  ;;  %v1219_v24 = vshll.u32 %v3721_v12, %v1207_v31  ;;  %v1222_v27 = vshll.u32 %v3722_v14, %v1207_v31 }
 0x1a5   : > { %v1211_v56 = vshrl.u32 %v3719_v6, %v1208_v42  ;;  %v1214_v50 = vshrl.u32 %v3720_v10, %v1208_v42  ;;  %v1217_v34 = vshrl.u32 %v3721_v12, %v1208_v42  ;;  %v1359_v60 = vshll.u32 %v1358_v46, 30 }
 0x1a6   : > { %v1072_v1 = vsel %vm989_vm2, %v1071_v43, %v1070_v57  ;;  %v1220_v53 = vshrl.u32 %v3722_v14, %v1208_v42  ;;  %v1223_v62 = vshrl.u32 %v3723_v29, %v1208_v42  ;;  %vm1298_vm2 = vcmp.lt.s32.totalorder %v4454_v37, 0 }
 0x1a7   : > { %v1075_v9 = vsel %vm4567_vm1, %v4320_v4, %v1072_v1  ;;  %v4671_v22 = vsub.s32 %v1356_v33, %v1359_v60  ;;  %v1212_v59 = vor.u32 %v1211_v56, %v1210_v51  ;;  %v1215_v11 = vor.u32 %v1214_v50, %v1213_v20 }
 0x1a8   : > { %3591 = vcosq.f32 %v1075_v9  ;;  %v1218_v32 = vor.u32 %v1217_v34, %v1216_v17  ;;  %v1221_v35 = vor.u32 %v1220_v53, %v1219_v24  ;;  %v1382_v52 = vsub.s32 4, %v1358_v46 }
 0x1a9   : > { %3593 = vsinq.f32 %v1075_v9  ;;  %v1362_v2 = vsub.s32 0, %v4671_v22  ;;  %vm4679_vm1 = vcmp.le.f32.partialorder %v1296_v5, 0.7853982  ;;  %v1209_v41 = vshrl.u32 %v3718_v0, %v1208_v42 }
 0x1aa   : > { %v1505_v19 = vand.u32 2139095040, %v4656_v47  ;;  %v1224_v36 = vor.u32 %v1223_v62, %v1222_v27  ;;  %vm1225_vm4 = vcmp.lt.s32.totalorder %v1206_v3, 1  ;;  %vm1228_vm5 = vcmp.lt.s32.totalorder %v1206_v3, 4 }
 0x1ab   : > { %v3368_v54 = vmin.u32 %v1362_v2, %v4671_v22  ;;  %vm1082_vm6 = vcmp.eq.s32.totalorder %v4649_v15, 0  ;;  %vm2440_vm7 = vcmp.eq.s32.totalorder %v4651_v25, 0  ;;  %vm1227_vm8 = vcmp.lt.s32.totalorder %v1206_v3, 3 }
 0x1ac   : > { %v1230_v5 = vsel %vm1228_vm5, %v1218_v32, 2102212464  ;;  %v1233_v39 = vsel %vm1225_vm4, %v1212_v59, %v1215_v11  ;;  %v1234_v58 = vsel %vm1228_vm5, %v1221_v35, 920167782  ;;  %vm1081_vm9 = vcmp.lt.s32.totalorder %v4649_v15, 2 }
 0x1ad   : > { %vm2439_vm10 = vcmp.lt.s32.totalorder %v4651_v25, 2  ;;  %v1364_v28 = vclz %v3368_v54  ;;  %v1383_v30 = vsel %vm1298_vm2, %v1382_v52, %v1358_v46  ;;  %v1235_v21 = vsel %vm1227_vm8, %v1218_v32, %v1234_v58  ;;  %v428_v52 = vpop.permute.xlu1 %427 }
 0x1ae   : > { %v1502_v49 = vand.u32 2147483647, %v4656_v47  ;;  %vm1079_vm11 = vweird.f32 %v4320_v4  ;;  %vm1226_vm12 = vcmp.lt.s32.totalorder %v1206_v3, 2  ;;  %v1229_v63 = vsel %vm1225_vm4, %v1209_v41, %v1212_v59 }
 0x1af   : > { %v1231_v7 = vsel %vm1227_vm8, %v1215_v11, %v1230_v5  ;;  %v1237_v33 = vsel %vm1225_vm4, %v1215_v11, %v1218_v32  ;;  %v1352_v13 = vadd.s32 %v4607_v26, %v4617_v48  ;;  %v3369_v31 = vadd.s32 4294967294, %v1364_v28 }
 0x1b0   : > { %v1236_v57 = vsel %vm1226_vm12, %v1233_v39, %v1235_v21  ;;  %v1238_v55 = vsel %vm1228_vm5, %v1224_v36, 1326507024  ;;  %v1506_v40 = vshrl.u32 %v1505_v19, 23  ;;  %v1385_v56 = vsel %vm4679_vm1, 0, %v1383_v30 }
 0x1b1   : > { %v1239_v42 = vsel %vm1227_vm8, %v1221_v35, %v1238_v55  ;;  %v4710_v43 = vmul.u32.u64.low %v4684_v44, %v1236_v57  ;;  %v4711_v46 = vmul.u32.u64.high %v4684_v44, %v1236_v57, %v4710_v43  ;;  %vm3370_vm13 = vcmp.lt.s32.totalorder %v3369_v31, 0 }
 0x1b2   : > { %v3592_v51 = vpop.eup %3591  ;;  %v1232_v50 = vsel %vm1226_vm12, %v1229_v63, %v1231_v7  ;;  %v1240_v34 = vsel %vm1226_vm12, %v1237_v33, %v1239_v42  ;;  %v1367_v1 = vsel %vm3370_vm13, 0, %v3369_v31  ;;  %v3375_v32 = vadd.s32 4294967169, %v1506_v40 }
 0x1b3   : > { %v3594_v26 = vpop.eup %3593  ;;  %v1086_v48 = vxor.u32 2147483648, %v3592_v51  ;;  %v4717_v60 = vmul.u32.u64.low %v4684_v44, %v1240_v34  ;;  %v4718_v20 = vmul.u32.u64.high %v4684_v44, %v1240_v34, %v4717_v60  ;;  %v1368_v9 = vsub.s32 32, %v1367_v1 }
 0x1b4   : > { %v1083_v53 = vxor.u32 2147483648, %v3594_v26  ;;  %v1369_v3 = vshll.u32 %v4671_v22, %v1367_v1  ;;  %v1372_v17 = vsub.s32 4294967266, %v1367_v1  ;;  %v1251_v11 = vadd.s32 1, %v4711_v46 }
 0x1b5   : > { %v1087_v24 = vsel %vm1085_vm3, %v1086_v48, %v3594_v26  ;;  %v2445_v59 = vsel %vm2443_vm0, %v1086_v48, %v3594_v26  ;;  %v1370_v2 = vshrl.u32 %v1352_v13, %v1368_v9  ;;  %v1248_v19 = vmul.u32 %v4684_v44, %v1232_v50 }
 0x1b6   : > { %v1084_v35 = vsel %vm1082_vm6, %v3592_v51, %v1083_v53  ;;  %v2442_v62 = vsel %vm2440_vm7, %v3592_v51, %v1083_v53  ;;  %v1373_v22 = vadd.s32 127, %v1372_v17  ;;  %vm1250_vm14 = vc.u32 %v4718_v20, %v4710_v43 }
 0x1b7   : > { %v1088_v27 = vsel %vm1081_vm9, %v1084_v35, %v1087_v24  ;;  %v2446_v41 = vsel %vm2439_vm10, %v2442_v62, %v2445_v59  ;;  %v1371_v5 = vor.u32 %v1370_v2, %v1369_v3  ;;  %v1252_v15 = vsel %vm1250_vm14, %v1251_v11, %v4711_v46 }
 0x1b8   : > { %v1089_v54 = vsel %vm1079_vm11, nan, %v1088_v27  ;;  %v2447_v36 = vsel %vm1079_vm11, nan, %v2446_v41  ;;  %v1374_v39 = vshll.u32 %v1373_v22, 23  ;;  %v1512_v58 = vadd.s32 1, %v3375_v32 }
 0x1b9   : > { %1816 = vst [vmem:[%s4136_s7 + $0x28] sm:$0xff] %v1089_v54  ;;  %3181 = vst [vmem:[%s4141_s8 + $0x28] sm:$0xff] %v2447_v36  ;;  %v455_v25 = vmul.f32 %v3849_v16, %v428_v52  ;;  %v1253_v44 = vadd.s32 %v1252_v15, %v1248_v19  ;;  %v2749_v30 = vadd.s32 3, %v1385_v56  ;;  %v1509_v21 = vand.u32 8388607, %v1502_v49 }
 0x1ba   : > { %v1375_v28 = vor.u32 4788187, %v1374_v39  ;;  %vm1513_vm15 = vcmp.gt.s32.totalorder %v1512_v58, 0  ;;  %v1378_v7 = vcvt.s32.f32 %v1371_v5  ;;  %v4750_v42 = vand.u32 3, %v1385_v56 }
 0x1bb   : > { %v1254_v4 = vadd.s32 536870912, %v1253_v44  ;;  %v1514_v33 = vsel %vm1513_vm15, %v1512_v58, 0  ;;  %v4748_v31 = vadd.f32 %v455_v25, %v3845_v8  ;;  %vm1195_vm3 = vcmp.lt.s32.totalorder %v4540_v45, 0 }
 0x1bc   : > { %v1376_v63 = vand.u32 2147483647, %v1375_v28  ;;  %v1516_v13 = vand.u32 31, %v1514_v33  ;;  %v4753_v51 = vand.u32 3, %v2749_v30  ;;  %v1510_v34 = vor.u32 8388608, %v1509_v21 }
 0x1bd   : > { %v1255_v55 = vshrl.u32 %v1254_v4, 30  ;;  %v4755_v26 = vshrl.u32 %v1514_v33, 5  ;;  %v1402_v8 = vand.u32 2139095040, %v4748_v31  ;;  %v1249_v38 = vadd.s32 %v4710_v43, %v4718_v20 }
 0x1be   : > { %v1379_v57 = vmul.f32 %v1378_v7, %v1376_v63  ;;  %v1517_v46 = vsub.s32 32, %v1516_v13  ;;  %v1519_v17 = vshll.u32 %v3718_v0, %v1516_v13  ;;  %v1522_v24 = vshll.u32 %v3719_v6, %v1516_v13 }
 0x1bf   : > { %v1256_v50 = vshll.u32 %v1255_v55, 30  ;;  %v1525_v59 = vshll.u32 %v3720_v10, %v1516_v13  ;;  %v1279_v32 = vsub.s32 4, %v1255_v55  ;;  %v1528_v35 = vshll.u32 %v3721_v12, %v1516_v13 }
 0x1c0   : > { %v1380_v40 = vxor.u32 2147483648, %v1379_v57  ;;  %v1520_v48 = vshrl.u32 %v3719_v6, %v1517_v46  ;;  %v1523_v1 = vshrl.u32 %v3720_v10, %v1517_v46  ;;  %v1526_v53 = vshrl.u32 %v3721_v12, %v1517_v46 }
 0x1c1   : > { %v4762_v60 = vsub.s32 %v1253_v44, %v1256_v50  ;;  %v1529_v9 = vshrl.u32 %v3722_v14, %v1517_v46  ;;  %v4782_v22 = vshll.u32 %v1510_v34, 8  ;;  %v1518_v54 = vshrl.u32 %v3718_v0, %v1517_v46 }
 0x1c2   : > { %v1381_v56 = vsel %vm1298_vm2, %v1380_v40, %v1379_v57  ;;  %vm4776_vm2 = vcmp.le.f32.partialorder %v1193_v61, 0.7853982  ;;  %v1521_v2 = vor.u32 %v1520_v48, %v1519_v17  ;;  %v1524_v27 = vor.u32 %v1523_v1, %v1522_v24 }
 0x1c3   : > { %v1384_v3 = vsel %vm4679_vm1, %v4454_v37, %v1381_v56  ;;  %v1259_v11 = vsub.s32 0, %v4762_v60  ;;  %v1527_v41 = vor.u32 %v1526_v53, %v1525_v59  ;;  %v1530_v19 = vor.u32 %v1529_v9, %v1528_v35 }
 0x1c4   : > { %3595 = vcosq.f32 %v1384_v3  ;;  %v1531_v36 = vshll.u32 %v3722_v14, %v1516_v13  ;;  %v1532_v61 = vshrl.u32 %v3723_v29, %v1517_v46  ;;  %v1403_v5 = vshrl.u32 %v1402_v8, 23 }
 0x1c5   : > { %3597 = vsinq.f32 %v1384_v3  ;;  %v3364_v52 = vmin.u32 %v1259_v11, %v4762_v60  ;;  %vm1394_vm1 = vcmp.eq.s32.totalorder %v4750_v42, 2  ;;  %vm2755_vm0 = vcmp.eq.s32.totalorder %v4753_v51, 2 }
 0x1c6   : > { %v1280_v20 = vsel %vm1195_vm3, %v1279_v32, %v1255_v55  ;;  %vm1534_vm4 = vcmp.lt.s32.totalorder %v4755_v26, 1  ;;  %vm1535_vm5 = vcmp.lt.s32.totalorder %v4755_v26, 2  ;;  %vm1391_vm6 = vcmp.eq.s32.totalorder %v4750_v42, 0 }
 0x1c7   : > { %v1261_v43 = vclz %v3364_v52  ;;  %vm2752_vm7 = vcmp.eq.s32.totalorder %v4753_v51, 0  ;;  %v1533_v39 = vor.u32 %v1532_v61, %v1531_v36  ;;  %vm1536_vm8 = vcmp.lt.s32.totalorder %v4755_v26, 3 }
 0x1c8   : > { %vm1537_vm9 = vcmp.lt.s32.totalorder %v4755_v26, 4  ;;  %v1538_v15 = vsel %vm1534_vm4, %v1518_v54, %v1521_v2  ;;  %vm1390_vm10 = vcmp.lt.s32.totalorder %v4750_v42, 2  ;;  %vm2751_vm11 = vcmp.lt.s32.totalorder %v4753_v51, 2 }
 0x1c9   : > { %v3365_v58 = vadd.s32 4294967294, %v1261_v43  ;;  %v1539_v25 = vsel %vm1537_vm9, %v1527_v41, 2102212464  ;;  %v1542_v28 = vsel %vm1534_vm4, %v1521_v2, %v1524_v27  ;;  %v1543_v44 = vsel %vm1537_vm9, %v1530_v19, 920167782 }
 0x1ca   : > { %v1540_v30 = vsel %vm1536_vm8, %v1524_v27, %v1539_v25  ;;  %v1544_v21 = vsel %vm1536_vm8, %v1527_v41, %v1543_v44  ;;  %v1546_v63 = vsel %vm1534_vm4, %v1524_v27, %v1527_v41  ;;  %v1547_v7 = vsel %vm1537_vm9, %v1533_v39, 1326507024  ;;  %v440_v25 = vpop.permute.xlu0 %439 }
 0x1cb   : > { %vm3366_vm12 = vcmp.lt.s32.totalorder %v3365_v58, 0  ;;  %v1545_v4 = vsel %vm1535_vm5, %v1542_v28, %v1544_v21  ;;  %v1548_v33 = vsel %vm1536_vm8, %v1530_v19, %v1547_v7  ;;  %v1399_v13 = vand.u32 2147483647, %v4748_v31 }
 0x1cc   : > { %v1264_v57 = vsel %vm3366_vm12, 0, %v3365_v58  ;;  %v1549_v55 = vsel %vm1535_vm5, %v1546_v63, %v1548_v33  ;;  %v4812_v46 = vmul.u32.u64.low %v4782_v22, %v1545_v4  ;;  %v4813_v40 = vmul.u32.u64.high %v4782_v22, %v1545_v4, %v4812_v46 }
 0x1cd   : > { %v1265_v34 = vsub.s32 32, %v1264_v57  ;;  %v1269_v48 = vsub.s32 4294967266, %v1264_v57  ;;  %v1282_v1 = vsel %vm4776_vm2, 0, %v1280_v20  ;;  %v1541_v8 = vsel %vm1535_vm5, %v1538_v15, %v1540_v30 }
 0x1ce   : > { %v3596_v50 = vpop.eup %3595  ;;  %v4821_v9 = vmul.u32.u64.low %v4782_v22, %v1549_v55  ;;  %v4822_v3 = vmul.u32.u64.high %v4782_v22, %v1549_v55, %v4821_v9  ;;  %v3371_v17 = vadd.s32 4294967169, %v1403_v5  ;;  %v1266_v59 = vshll.u32 %v4762_v60, %v1264_v57 }
 0x1cf   : > { %v3598_v56 = vpop.eup %3597  ;;  %v1395_v53 = vxor.u32 2147483648, %v3596_v50  ;;  %v1267_v11 = vshrl.u32 %v1249_v38, %v1265_v34  ;;  %v1270_v32 = vadd.s32 127, %v1269_v48  ;;  %v1560_v2 = vadd.s32 1, %v4813_v40 }
 0x1d0   : > { %v1392_v24 = vxor.u32 2147483648, %v3598_v56  ;;  %v1409_v52 = vadd.s32 1, %v3371_v17  ;;  %vm1388_vm13 = vweird.f32 %v4454_v37  ;;  %vm1559_vm14 = vc.u32 %v4822_v3, %v4812_v46 }
 0x1d1   : > { %v1396_v35 = vsel %vm1394_vm1, %v1395_v53, %v3598_v56  ;;  %v2757_v26 = vsel %vm2755_vm0, %v1395_v53, %v3598_v56  ;;  %v1268_v60 = vor.u32 %v1267_v11, %v1266_v59  ;;  %v1271_v38 = vshll.u32 %v1270_v32, 23 }
 0x1d2   : > { %v1393_v27 = vsel %vm1391_vm6, %v3596_v50, %v1392_v24  ;;  %v2754_v41 = vsel %vm2752_vm7, %v3596_v50, %v1392_v24  ;;  %v1557_v43 = vmul.u32 %v4782_v22, %v1541_v8  ;;  %v2645_v20 = vadd.s32 3, %v1282_v1 }
 0x1d3   : > { %v1397_v19 = vsel %vm1390_vm10, %v1393_v27, %v1396_v35  ;;  %v2758_v54 = vsel %vm2751_vm11, %v2754_v41, %v2757_v26  ;;  %v1272_v5 = vor.u32 4788187, %v1271_v38  ;;  %v1561_v39 = vsel %vm1559_vm14, %v1560_v2, %v4813_v40 }
 0x1d4   : > { %v1398_v36 = vsel %vm1388_vm13, nan, %v1397_v19  ;;  %v2759_v61 = vsel %vm1388_vm13, nan, %v2758_v54  ;;  %v1406_v37 = vand.u32 8388607, %v1399_v13  ;;  %vm1410_vm15 = vcmp.gt.s32.totalorder %v1409_v52, 0 }
 0x1d5   : > { %1819 = vst [vmem:[%s4136_s7 + $0x40] sm:$0xff] %v1398_v36  ;;  %3184 = vst [vmem:[%s4141_s8 + $0x40] sm:$0xff] %v2759_v61  ;;  %v1273_v42 = vand.u32 2147483647, %v1272_v5  ;;  %v1275_v51 = vcvt.s32.f32 %v1268_v60  ;;  %v1562_v15 = vadd.s32 %v1561_v39, %v1557_v43  ;;  %v1411_v58 = vsel %vm1410_vm15, %v1409_v52, 0 }
 0x1d6   : > { %v1413_v28 = vand.u32 31, %v1411_v58  ;;  %v1407_v21 = vor.u32 8388608, %v1406_v37  ;;  %v458_v22 = vmul.f32 %v3849_v16, %v440_v25  ;;  %v4848_v4 = vand.u32 3, %v1282_v1 }
 0x1d7   : > { %v1276_v44 = vmul.f32 %v1275_v51, %v1273_v42  ;;  %v1563_v30 = vadd.s32 536870912, %v1562_v15  ;;  %v4850_v33 = vand.u32 3, %v2645_v20  ;;  %v1412_v9 = vshrl.u32 %v1411_v58, 5 }
 0x1d8   : > { %v1414_v63 = vsub.s32 32, %v1413_v28  ;;  %v1416_v55 = vshll.u32 %v3718_v0, %v1413_v28  ;;  %v1419_v56 = vshll.u32 %v3719_v6, %v1413_v28  ;;  %v1422_v17 = vshll.u32 %v3720_v10, %v1413_v28 }
 0x1d9   : > { %v1277_v7 = vxor.u32 2147483648, %v1276_v44  ;;  %v1564_v57 = vshrl.u32 %v1563_v30, 30  ;;  %v1425_v24 = vshll.u32 %v3721_v12, %v1413_v28  ;;  %v1428_v62 = vshll.u32 %v3722_v14, %v1413_v28 }
 0x1da   : > { %v1417_v40 = vshrl.u32 %v3719_v6, %v1414_v63  ;;  %v1420_v50 = vshrl.u32 %v3720_v10, %v1414_v63  ;;  %v1423_v34 = vshrl.u32 %v3721_v12, %v1414_v63  ;;  %v1426_v1 = vshrl.u32 %v3722_v14, %v1414_v63 }
 0x1db   : > { %v1278_v48 = vsel %vm1195_vm3, %v1277_v7, %v1276_v44  ;;  %v1565_v8 = vshll.u32 %v1564_v57, 30  ;;  %v1429_v2 = vshrl.u32 %v3723_v29, %v1414_v63  ;;  %v1588_v27 = vsub.s32 4, %v1564_v57 }
 0x1dc   : > { %v1281_v53 = vsel %vm4776_vm2, %v4540_v45, %v1278_v48  ;;  %v1418_v11 = vor.u32 %v1417_v40, %v1416_v55  ;;  %v1421_v32 = vor.u32 %v1420_v50, %v1419_v56  ;;  %v1424_v35 = vor.u32 %v1423_v34, %v1422_v17 }
 0x1dd   : > { %3599 = vcosq.f32 %v1281_v53  ;;  %v4865_v59 = vsub.s32 %v1562_v15, %v1565_v8  ;;  %v1427_v26 = vor.u32 %v1426_v1, %v1425_v24  ;;  %v4871_v41 = vadd.f32 %v458_v22, %v3853_v23 }
 0x1de   : > { %3601 = vsinq.f32 %v1281_v53  ;;  %vm4875_vm3 = vcmp.le.f32.partialorder %v1502_v49, 0.7853982  ;;  %vm1504_vm2 = vcmp.lt.s32.totalorder %v4656_v47, 0  ;;  %v1415_v38 = vshrl.u32 %v3718_v0, %v1414_v63 }
 0x1df   : > { %v1568_v52 = vsub.s32 0, %v4865_v59  ;;  %v4881_v19 = vshll.u32 %v1407_v21, 8  ;;  %vm1291_vm1 = vcmp.eq.s32.totalorder %v4848_v4, 2  ;;  %vm2651_vm0 = vcmp.eq.s32.totalorder %v4850_v33, 2 }
 0x1e0   : > { %v1430_v23 = vor.u32 %v1429_v2, %v1428_v62  ;;  %vm1431_vm4 = vcmp.lt.s32.totalorder %v1412_v9, 1  ;;  %vm1434_vm5 = vcmp.lt.s32.totalorder %v1412_v9, 4  ;;  %vm1288_vm6 = vcmp.eq.s32.totalorder %v4848_v4, 0 }
 0x1e1   : > { %v3376_v54 = vmin.u32 %v1568_v52, %v4865_v59  ;;  %vm2648_vm7 = vcmp.eq.s32.totalorder %v4850_v33, 0  ;;  %vm1433_vm8 = vcmp.lt.s32.totalorder %v1412_v9, 3  ;;  %v1436_v49 = vsel %vm1434_vm5, %v1424_v35, 2102212464 }
 0x1e2   : > { %v1439_v36 = vsel %vm1431_vm4, %v1418_v11, %v1421_v32  ;;  %v1440_v61 = vsel %vm1434_vm5, %v1427_v26, 920167782  ;;  %vm1287_vm9 = vcmp.lt.s32.totalorder %v4848_v4, 2  ;;  %vm2647_vm10 = vcmp.lt.s32.totalorder %v4850_v33, 2 }
 0x1e3   : > { %v1570_v5 = vclz %v3376_v54  ;;  %v1589_v43 = vsel %vm1504_vm2, %v1588_v27, %v1564_v57  ;;  %v1441_v20 = vsel %vm1433_vm8, %v1424_v35, %v1440_v61  ;;  %v1711_v39 = vand.u32 2139095040, %v4871_v41 }
 0x1e4   : > { %vm1285_vm11 = vweird.f32 %v4540_v45  ;;  %vm1432_vm12 = vcmp.lt.s32.totalorder %v1412_v9, 2  ;;  %v1435_v37 = vsel %vm1431_vm4, %v1415_v38, %v1418_v11  ;;  %v1437_v42 = vsel %vm1433_vm8, %v1421_v32, %v1436_v49 }
 0x1e5   : > { %v1443_v51 = vsel %vm1431_vm4, %v1421_v32, %v1424_v35  ;;  %v1558_v15 = vadd.s32 %v4812_v46, %v4822_v3  ;;  %v3377_v58 = vadd.s32 4294967294, %v1570_v5  ;;  %v1442_v25 = vsel %vm1432_vm12, %v1439_v36, %v1441_v20 }
 0x1e6   : > { %v1444_v28 = vsel %vm1434_vm5, %v1430_v23, 1326507024  ;;  %v1591_v44 = vsel %vm4875_vm3, 0, %v1589_v43  ;;  %v4908_v21 = vmul.u32.u64.low %v4881_v19, %v1442_v25  ;;  %v4909_v63 = vmul.u32.u64.high %v4881_v19, %v1442_v25, %v4908_v21 }
 0x1e7   : > { %v1445_v30 = vsel %vm1433_vm8, %v1427_v26, %v1444_v28  ;;  %v3600_v22 = vpop.eup %3599  ;;  %vm3378_vm13 = vcmp.lt.s32.totalorder %v3377_v58, 0  ;;  %v1438_v7 = vsel %vm1432_vm12, %v1435_v37, %v1437_v42  ;;  %v1712_v55 = vshrl.u32 %v1711_v39, 23  ;;  %v436_v26 = vpop.permute.xlu1 %435 }
 0x1e8   : > { %v1446_v57 = vsel %vm1432_vm12, %v1443_v51, %v1445_v30  ;;  %v3602_v46 = vpop.eup %3601  ;;  %v1292_v3 = vxor.u32 2147483648, %v3600_v22  ;;  %v1573_v40 = vsel %vm3378_vm13, 0, %v3377_v58  ;;  %v1457_v17 = vadd.s32 1, %v4909_v63 }
 0x1e9   : > { %v4913_v50 = vmul.u32.u64.low %v4881_v19, %v1446_v57  ;;  %v4914_v34 = vmul.u32.u64.high %v4881_v19, %v1446_v57, %v4913_v50  ;;  %v1289_v48 = vxor.u32 2147483648, %v3602_v46  ;;  %v1574_v8 = vsub.s32 32, %v1573_v40 }
 0x1ea   : > { %v1575_v56 = vshll.u32 %v4865_v59, %v1573_v40  ;;  %v1578_v1 = vsub.s32 4294967266, %v1573_v40  ;;  %v1293_v53 = vsel %vm1291_vm1, %v1292_v3, %v3602_v46  ;;  %v2653_v9 = vsel %vm2651_vm0, %v1292_v3, %v3602_v46 }
 0x1eb   : > { %v3383_v24 = vadd.s32 4294967169, %v1712_v55  ;;  %v1290_v11 = vsel %vm1288_vm6, %v3600_v22, %v1289_v48  ;;  %v2650_v32 = vsel %vm2648_vm7, %v3600_v22, %v1289_v48  ;;  %v1576_v35 = vshrl.u32 %v1558_v15, %v1574_v8 }
 0x1ec   : > { %v1579_v59 = vadd.s32 127, %v1578_v1  ;;  %v1294_v2 = vsel %vm1287_vm9, %v1290_v11, %v1293_v53  ;;  %v2654_v52 = vsel %vm2647_vm10, %v2650_v32, %v2653_v9  ;;  %v1454_v27 = vmul.u32 %v4881_v19, %v1438_v7 }
 0x1ed   : > { %vm1456_vm14 = vc.u32 %v4914_v34, %v4908_v21  ;;  %v1295_v62 = vsel %vm1285_vm11, nan, %v1294_v2  ;;  %v2655_v38 = vsel %vm1285_vm11, nan, %v2654_v52  ;;  %v1577_v54 = vor.u32 %v1576_v35, %v1575_v56 }
 0x1ee   : > { %v1580_v23 = vshll.u32 %v1579_v59, 23  ;;  %1818 = vst [vmem:[%s4136_s7 + $0x38] sm:$0xff] %v1295_v62  ;;  %3183 = vst [vmem:[%s4141_s8 + $0x38] sm:$0xff] %v2655_v38  ;;  %v1458_v4 = vsel %vm1456_vm14, %v1457_v17, %v4909_v63  ;;  %v1708_v33 = vand.u32 2147483647, %v4871_v41  ;;  %v1718_v49 = vadd.s32 1, %v3383_v24 }
 0x1ef   : > { %v457_v19 = vmul.f32 %v3849_v16, %v436_v26  ;;  %v1459_v61 = vadd.s32 %v1458_v4, %v1454_v27  ;;  %v2957_v5 = vadd.s32 3, %v1591_v44  ;;  %v1584_v20 = vcvt.s32.f32 %v1577_v54 }
 0x1f0   : > { %v1581_v36 = vor.u32 4788187, %v1580_v23  ;;  %vm1719_vm15 = vcmp.gt.s32.totalorder %v1718_v49, 0  ;;  %v1715_v37 = vand.u32 8388607, %v1708_v33  ;;  %v4949_v28 = vand.u32 3, %v1591_v44 }
 0x1f1   : > { %v1460_v39 = vadd.s32 536870912, %v1459_v61  ;;  %v1720_v45 = vsel %vm1719_vm15, %v1718_v49, 0  ;;  %v4945_v51 = vadd.f32 %v457_v19, %v3851_v18  ;;  %v4951_v30 = vand.u32 3, %v2957_v5 }
 0x1f2   : > { %v1582_v43 = vand.u32 2147483647, %v1581_v36  ;;  %v1722_v42 = vand.u32 31, %v1720_v45  ;;  %v1716_v22 = vor.u32 8388608, %v1715_v37  ;;  %v1721_v50 = vshrl.u32 %v1720_v45, 5 }
 0x1f3   : > { %v4947_v58 = vshrl.u32 %v1460_v39, 30  ;;  %v1608_v55 = vand.u32 2139095040, %v4945_v51  ;;  %vm1597_vm4 = vcmp.eq.s32.totalorder %v4949_v28, 0  ;;  %vm2960_vm5 = vcmp.eq.s32.totalorder %v4951_v30, 0 }
 0x1f4   : > { %v1585_v15 = vmul.f32 %v1584_v20, %v1582_v43  ;;  %v1723_v25 = vsub.s32 32, %v1722_v42  ;;  %v1725_v48 = vshll.u32 %v3718_v0, %v1722_v42  ;;  %v1728_v8 = vshll.u32 %v3719_v6, %v1722_v42 }
 0x1f5   : > { %v1462_v63 = vshll.u32 %v4947_v58, 30  ;;  %v1731_v1 = vshll.u32 %v3720_v10, %v1722_v42  ;;  %v1734_v53 = vshll.u32 %v3721_v12, %v1722_v42  ;;  %v1737_v35 = vshll.u32 %v3722_v14, %v1722_v42 }
 0x1f6   : > { %v1586_v16 = vxor.u32 2147483648, %v1585_v15  ;;  %v1726_v7 = vshrl.u32 %v3719_v6, %v1723_v25  ;;  %v1729_v57 = vshrl.u32 %v3720_v10, %v1723_v25  ;;  %v1732_v3 = vshrl.u32 %v3721_v12, %v1723_v25 }
 0x1f7   : > { %v4959_v46 = vsub.s32 %v1459_v61, %v1462_v63  ;;  %v1735_v44 = vshrl.u32 %v3722_v14, %v1723_v25  ;;  %v1724_v32 = vshrl.u32 %v3718_v0, %v1723_v25  ;;  %v1738_v59 = vshrl.u32 %v3723_v29, %v1723_v25 }
 0x1f8   : > { %v1587_v18 = vsel %vm1504_vm2, %v1586_v16, %v1585_v15  ;;  %v1727_v9 = vor.u32 %v1726_v7, %v1725_v48  ;;  %v1730_v24 = vor.u32 %v1729_v57, %v1728_v8  ;;  %v1733_v11 = vor.u32 %v1732_v3, %v1731_v1 }
 0x1f9   : > { %v1590_v40 = vsel %vm4875_vm3, %v4656_v47, %v1587_v18  ;;  %v1465_v56 = vsub.s32 0, %v4959_v46  ;;  %v1736_v60 = vor.u32 %v1735_v44, %v1734_v53  ;;  %v4975_v26 = vshll.u32 %v1716_v22, 8 }
 0x1fa   : > { %3603 = vcosq.f32 %v1590_v40  ;;  %vm1600_vm3 = vcmp.eq.s32.totalorder %v4949_v28, 2  ;;  %vm2963_vm2 = vcmp.eq.s32.totalorder %v4951_v30, 2  ;;  %vm1740_vm1 = vcmp.lt.s32.totalorder %v1721_v50, 1 }
 0x1fb   : > { %3605 = vsinq.f32 %v1590_v40  ;;  %v3372_v17 = vmin.u32 %v1465_v56, %v4959_v46  ;;  %vm1741_vm0 = vcmp.lt.s32.totalorder %v1721_v50, 2  ;;  %v1609_v52 = vshrl.u32 %v1608_v55, 23 }
 0x1fc   : > { %v1739_v27 = vor.u32 %v1738_v59, %v1737_v35  ;;  %vm1742_vm6 = vcmp.lt.s32.totalorder %v1721_v50, 3  ;;  %vm1743_vm7 = vcmp.lt.s32.totalorder %v1721_v50, 4  ;;  %v1744_v62 = vsel %vm1740_vm1, %v1724_v32, %v1727_v9 }
 0x1fd   : > { %v1467_v2 = vclz %v3372_v17  ;;  %vm1596_vm8 = vcmp.lt.s32.totalorder %v4949_v28, 2  ;;  %vm2959_vm9 = vcmp.lt.s32.totalorder %v4951_v30, 2  ;;  %vm1401_vm10 = vcmp.lt.s32.totalorder %v4748_v31, 0 }
 0x1fe   : > { %v1745_v54 = vsel %vm1743_vm7, %v1733_v11, 2102212464  ;;  %v1748_v23 = vsel %vm1740_vm1, %v1727_v9, %v1730_v24  ;;  %v1749_v4 = vsel %vm1743_vm7, %v1736_v60, 920167782  ;;  %vm1594_vm11 = vweird.f32 %v4656_v47 }
 0x1ff   : > { %v3373_v38 = vadd.s32 4294967294, %v1467_v2  ;;  %v1746_v49 = vsel %vm1742_vm6, %v1730_v24, %v1745_v54  ;;  %v1750_v19 = vsel %vm1742_vm6, %v1733_v11, %v1749_v4  ;;  %v1752_v36 = vsel %vm1740_vm1, %v1730_v24, %v1733_v11 }
 0x200   : > { %v1753_v61 = vsel %vm1743_vm7, %v1739_v27, 1326507024  ;;  %v1455_v5 = vadd.s32 %v4908_v21, %v4914_v34  ;;  %v1751_v43 = vsel %vm1741_vm0, %v1748_v23, %v1750_v19  ;;  %v1485_v63 = vsub.s32 4, %v4947_v58 }
 0x201   : > { %vm3374_vm12 = vcmp.lt.s32.totalorder %v3373_v38, 0  ;;  %v1754_v20 = vsel %vm1742_vm6, %v1736_v60, %v1753_v61  ;;  %v4996_v37 = vmul.u32.u64.low %v4975_v26, %v1751_v43  ;;  %v4997_v42 = vmul.u32.u64.high %v4975_v26, %v1751_v43, %v4996_v37 }
 0x202   : > { %v1470_v39 = vsel %vm3374_vm12, 0, %v3373_v38  ;;  %v1755_v45 = vsel %vm1741_vm0, %v1752_v36, %v1754_v20  ;;  %v1747_v21 = vsel %vm1741_vm0, %v1744_v62, %v1746_v49  ;;  %v3379_v55 = vadd.s32 4294967169, %v1609_v52 }
 0x203   : > { %v1471_v25 = vsub.s32 32, %v1470_v39  ;;  %v1475_v16 = vsub.s32 4294967266, %v1470_v39  ;;  %v5003_v7 = vmul.u32.u64.low %v4975_v26, %v1755_v45  ;;  %v5004_v57 = vmul.u32.u64.high %v4975_v26, %v1755_v45, %v5003_v7 }
 0x204   : > { %v3604_v15 = vpop.eup %3603  ;;  %v1472_v3 = vshll.u32 %v4959_v46, %v1470_v39  ;;  %v1766_v8 = vadd.s32 1, %v4997_v42  ;;  %v1615_v56 = vadd.s32 1, %v3379_v55  ;;  %v1486_v11 = vsel %vm1401_vm10, %v1485_v63, %v4947_v58 }
 0x205   : > { %v3606_v34 = vpop.eup %3605  ;;  %v1601_v22 = vxor.u32 2147483648, %v3604_v15  ;;  %v1473_v44 = vshrl.u32 %v1455_v5, %v1471_v25  ;;  %v1476_v40 = vadd.s32 127, %v1475_v16  ;;  %vm1765_vm13 = vc.u32 %v5004_v57, %v4996_v37 }
 0x206   : > { %v1598_v18 = vxor.u32 2147483648, %v3606_v34  ;;  %v1763_v28 = vmul.u32 %v4975_v26, %v1747_v21  ;;  %vm5034_vm14 = vcmp.le.f32.partialorder %v1399_v13, 0.7853982  ;;  %v1767_v58 = vsel %vm1765_vm13, %v1766_v8, %v4997_v42 }
 0x207   : > { %v1602_v48 = vsel %vm1600_vm3, %v1601_v22, %v3606_v34  ;;  %v2965_v50 = vsel %vm2963_vm2, %v1601_v22, %v3606_v34  ;;  %v1474_v46 = vor.u32 %v1473_v44, %v1472_v3  ;;  %v1477_v9 = vshll.u32 %v1476_v40, 23 }
 0x208   : > { %v1599_v1 = vsel %vm1597_vm4, %v3604_v15, %v1598_v18  ;;  %v2962_v53 = vsel %vm2960_vm5, %v3604_v15, %v1598_v18  ;;  %v1605_v59 = vand.u32 2147483647, %v4945_v51  ;;  %vm1616_vm15 = vcmp.gt.s32.totalorder %v1615_v56, 0 }
 0x209   : > { %v1603_v17 = vsel %vm1596_vm8, %v1599_v1, %v1602_v48  ;;  %v2966_v24 = vsel %vm2959_vm9, %v2962_v53, %v2965_v50  ;;  %v1478_v35 = vor.u32 4788187, %v1477_v9  ;;  %v1481_v52 = vcvt.s32.f32 %v1474_v46 }
 0x20a   : > { %v1604_v60 = vsel %vm1594_vm11, nan, %v1603_v17  ;;  %v2967_v32 = vsel %vm1594_vm11, nan, %v2966_v24  ;;  %v1768_v47 = vadd.s32 %v1767_v58, %v1763_v28  ;;  %v1617_v27 = vsel %vm1616_vm15, %v1615_v56, 0 }
 0x20b   : > { %1821 = vst [vmem:[%s4136_s7 + $0x50] sm:$0xff] %v1604_v60  ;;  %3186 = vst [vmem:[%s4141_s8 + $0x50] sm:$0xff] %v2967_v32  ;;  %v1479_v2 = vand.u32 2147483647, %v1478_v35  ;;  %v1488_v26 = vsel %vm5034_vm14, 0, %v1486_v11  ;;  %v1619_v62 = vand.u32 31, %v1617_v27  ;;  %vm1491_vm7 = vweird.f32 %v4748_v31 }
 0x20c   : > { %v1769_v54 = vadd.s32 536870912, %v1768_v47  ;;  %v5042_v4 = vand.u32 3, %v1488_v26  ;;  %v1612_v19 = vand.u32 8388607, %v1605_v59  ;;  %v2853_v36 = vadd.s32 3, %v1488_v26 }
 0x20d   : > { %v1482_v38 = vmul.f32 %v1481_v52, %v1479_v2  ;;  %v1620_v23 = vsub.s32 32, %v1619_v62  ;;  %v1622_v61 = vshll.u32 %v3718_v0, %v1619_v62  ;;  %v1618_v25 = vshrl.u32 %v1617_v27, 5 }
 0x20e   : > { %v5044_v49 = vshrl.u32 %v1769_v54, 30  ;;  %v1625_v16 = vshll.u32 %v3719_v6, %v1619_v62  ;;  %v1631_v63 = vshll.u32 %v3721_v12, %v1619_v62  ;;  %v1628_v22 = vshll.u32 %v3720_v10, %v1619_v62 }
 0x20f   : > { %v1483_v13 = vxor.u32 2147483648, %v1482_v38  ;;  %v1623_v5 = vshrl.u32 %v3719_v6, %v1620_v23  ;;  %v1626_v43 = vshrl.u32 %v3720_v10, %v1620_v23  ;;  %v1629_v45 = vshrl.u32 %v3721_v12, %v1620_v23 }
 0x210   : > { %v1771_v39 = vshll.u32 %v5044_v49, 30  ;;  %v1632_v42 = vshrl.u32 %v3722_v14, %v1620_v23  ;;  %v1635_v18 = vshrl.u32 %v3723_v29, %v1620_v23  ;;  %v2854_v3 = vand.u32 3, %v2853_v36 }
 0x211   : > { %v1484_v20 = vsel %vm1401_vm10, %v1483_v13, %v1482_v38  ;;  %v1624_v34 = vor.u32 %v1623_v5, %v1622_v61  ;;  %v1627_v7 = vor.u32 %v1626_v43, %v1625_v16  ;;  %v1630_v40 = vor.u32 %v1629_v45, %v1628_v22 }
 0x212   : > { %v1487_v15 = vsel %vm5034_vm14, %v4748_v31, %v1484_v20  ;;  %v5061_v21 = vsub.s32 %v1768_v47, %v1771_v39  ;;  %v1633_v55 = vor.u32 %v1632_v42, %v1631_v63  ;;  %v1634_v48 = vshll.u32 %v3722_v14, %v1619_v62 }
 0x213   : > { %3607 = vcosq.f32 %v1487_v15  ;;  %v1613_v6 = vor.u32 8388608, %v1612_v19  ;;  %vm1637_vm3 = vcmp.lt.s32.totalorder %v1618_v25, 1  ;;  %vm1640_vm2 = vcmp.lt.s32.totalorder %v1618_v25, 4 }
 0x214   : > { %3609 = vsinq.f32 %v1487_v15  ;;  %v1774_v44 = vsub.s32 0, %v5061_v21  ;;  %v1636_v50 = vor.u32 %v1635_v18, %v1634_v48  ;;  %vm1494_vm1 = vcmp.eq.s32.totalorder %v5042_v4, 0 }
 0x215   : > { %vm1497_vm0 = vcmp.eq.s32.totalorder %v5042_v4, 2  ;;  %vm1639_vm4 = vcmp.lt.s32.totalorder %v1618_v25, 3  ;;  %v1645_v10 = vsel %vm1637_vm3, %v1624_v34, %v1627_v7  ;;  %v1646_v29 = vsel %vm1640_vm2, %v1633_v55, 920167782 }
 0x216   : > { %v3384_v12 = vmin.u32 %v1774_v44, %v5061_v21  ;;  %vm1493_vm5 = vcmp.lt.s32.totalorder %v5042_v4, 2  ;;  %vm2855_vm6 = vcmp.lt.s32.totalorder %v2854_v3, 2  ;;  %v1621_v14 = vshrl.u32 %v3718_v0, %v1620_v23 }
 0x217   : > { %v1642_v56 = vsel %vm1640_vm2, %v1630_v40, 2102212464  ;;  %v1647_v1 = vsel %vm1639_vm4, %v1630_v40, %v1646_v29  ;;  %vm2856_vm8 = vcmp.eq.s32.totalorder %v2854_v3, 0  ;;  %vm1638_vm9 = vcmp.lt.s32.totalorder %v1618_v25, 2 }
 0x218   : > { %v1776_v8 = vclz %v3384_v12  ;;  %v1649_v53 = vsel %vm1637_vm3, %v1627_v7, %v1630_v40  ;;  %v1653_v46 = vshll.u32 %v1613_v6, 8  ;;  %v1641_v17 = vsel %vm1637_vm3, %v1621_v14, %v1624_v34 }
 0x219   : > { %v1648_v24 = vsel %vm1638_vm9, %v1645_v10, %v1647_v1  ;;  %v1650_v11 = vsel %vm1640_vm2, %v1636_v50, 1326507024  ;;  %v1643_v0 = vsel %vm1639_vm4, %v1627_v7, %v1642_v56  ;;  %vm2859_vm10 = vcmp.eq.s32.totalorder %v2854_v3, 2 }
 0x21a   : > { %v3385_v9 = vadd.s32 4294967294, %v1776_v8  ;;  %v1651_v60 = vsel %vm1639_vm4, %v1633_v55, %v1650_v11  ;;  %v5083_v32 = vmul.u32.u64.low %v1653_v46, %v1648_v24  ;;  %v5084_v35 = vmul.u32.u64.high %v1653_v46, %v1648_v24, %v5083_v32 }
 0x21b   : > { %v1764_v30 = vadd.s32 %v4996_v37, %v5004_v57  ;;  %v1652_v58 = vsel %vm1638_vm9, %v1649_v53, %v1651_v60  ;;  %v1644_v23 = vsel %vm1638_vm9, %v1641_v17, %v1643_v0  ;;  %v1794_v55 = vsub.s32 4, %v5044_v49 }
 0x21c   : > { %vm3386_vm11 = vcmp.lt.s32.totalorder %v3385_v9, 0  ;;  %v5090_v27 = vmul.u32.u64.low %v1653_v46, %v1652_v58  ;;  %v5091_v26 = vmul.u32.u64.high %v1653_v46, %v1652_v58, %v5090_v27  ;;  %v1663_v57 = vadd.s32 1, %v5084_v35 }
 0x21d   : > { %v3608_v28 = vpop.eup %3607  ;;  %v1779_v47 = vsel %vm3386_vm11, 0, %v3385_v9  ;;  %v1660_v45 = vmul.u32 %v1653_v46, %v1644_v23  ;;  %vm1710_vm13 = vcmp.lt.s32.totalorder %v4871_v41, 0  ;;  %vm1709_vm14 = vcmp.le.f32.partialorder %v1708_v33, 0.7853982 }
 0x21e   : > { %v3610_v2 = vpop.eup %3609  ;;  %v1498_v52 = vxor.u32 2147483648, %v3608_v28  ;;  %v1780_v38 = vsub.s32 32, %v1779_v47  ;;  %v1784_v54 = vsub.s32 4294967266, %v1779_v47  ;;  %v1781_v37 = vshll.u32 %v5061_v21, %v1779_v47 }
 0x21f   : > { %v1495_v62 = vxor.u32 2147483648, %v3610_v2  ;;  %vm1662_vm12 = vc.u32 %v5091_v26, %v5083_v32  ;;  %v1795_v40 = vsel %vm1710_vm13, %v1794_v55, %v5044_v49  ;;  %v1661_v33 = vadd.s32 %v5083_v32, %v5091_v26 }
 0x220   : > { %v1499_v13 = vsel %vm1497_vm0, %v1498_v52, %v3610_v2  ;;  %v2861_v19 = vsel %vm2859_vm10, %v1498_v52, %v3610_v2  ;;  %v1782_v5 = vshrl.u32 %v1764_v30, %v1780_v38  ;;  %v1785_v43 = vadd.s32 127, %v1784_v54 }
 0x221   : > { %v1496_v36 = vsel %vm1494_vm1, %v3608_v28, %v1495_v62  ;;  %v2858_v61 = vsel %vm2856_vm8, %v3608_v28, %v1495_v62  ;;  %v1664_v63 = vsel %vm1662_vm12, %v1663_v57, %v5084_v35  ;;  %v1797_v50 = vsel %vm1709_vm14, 0, %v1795_v40 }
 0x222   : > { %v1500_v20 = vsel %vm1493_vm5, %v1496_v36, %v1499_v13  ;;  %v2862_v39 = vsel %vm2855_vm6, %v2858_v61, %v2861_v19  ;;  %v1783_v25 = vor.u32 %v1782_v5, %v1781_v37  ;;  %v1786_v16 = vshll.u32 %v1785_v43, 23 }
 0x223   : > { %v1501_v42 = vsel %vm1491_vm7, nan, %v1500_v20  ;;  %v2863_v15 = vsel %vm1491_vm7, nan, %v2862_v39  ;;  %v1665_v21 = vadd.s32 %v1664_v63, %v1660_v45  ;;  %v3165_v8 = vadd.s32 3, %v1797_v50 }
 0x224   : > { %1820 = vst [vmem:[%s4136_s7 + $0x48] sm:$0xff] %v1501_v42  ;;  %3185 = vst [vmem:[%s4141_s8 + $0x48] sm:$0xff] %v2863_v15  ;;  %v1787_v4 = vor.u32 4788187, %v1786_v16  ;;  %v1790_v22 = vcvt.s32.f32 %v1783_v25  ;;  %v1801_v56 = vand.u32 3, %v1797_v50  ;;  %vm1800_vm6 = vweird.f32 %v4871_v41 }
 0x225   : > { %v1666_v7 = vadd.s32 536870912, %v1665_v21  ;;  %v3166_v53 = vand.u32 3, %v3165_v8  ;;  %vm1607_vm7 = vcmp.lt.s32.totalorder %v4945_v51, 0  ;;  %vm1606_vm8 = vcmp.le.f32.partialorder %v1605_v59, 0.7853982 }
 0x226   : > { %v1788_v34 = vand.u32 2147483647, %v1787_v4  ;;  %vm1802_vm3 = vcmp.lt.s32.totalorder %v1801_v56, 2  ;;  %vm1803_vm2 = vcmp.eq.s32.totalorder %v1801_v56, 0  ;;  %vm1806_vm1 = vcmp.eq.s32.totalorder %v1801_v56, 2 }
 0x227   : > { %v1667_v3 = vshrl.u32 %v1666_v7, 30  ;;  %vm3171_vm0 = vcmp.eq.s32.totalorder %v3166_v53, 2  ;;  %vm3167_vm4 = vcmp.lt.s32.totalorder %v3166_v53, 2  ;;  %vm3168_vm5 = vcmp.eq.s32.totalorder %v3166_v53, 0 }
 0x228   : > { %v1791_v18 = vmul.f32 %v1790_v22, %v1788_v34 }
 0x229   : > { %v1668_v31 = vshll.u32 %v1667_v3, 30  ;;  %v1691_v37 = vsub.s32 4, %v1667_v3 }
 0x22a   : > { %v1792_v44 = vxor.u32 2147483648, %v1791_v18 }
 0x22b   : > { %v1669_v6 = vsub.s32 %v1665_v21, %v1668_v31 }
 0x22c   : > { %v1793_v48 = vsel %vm1710_vm13, %v1792_v44, %v1791_v18 }
 0x22d   : > { %v1796_v12 = vsel %vm1709_vm14, %v4871_v41, %v1793_v48  ;;  %v1671_v10 = vsub.s32 0, %v1669_v6  ;;  %v1692_v41 = vsel %vm1607_vm7, %v1691_v37, %v1667_v3 }
 0x22e   : > { %3611 = vcosq.f32 %v1796_v12  ;;  %v1694_v5 = vsel %vm1606_vm8, 0, %v1692_v41 }
 0x22f   : > { %3613 = vsinq.f32 %v1796_v12  ;;  %v3380_v29 = vmin.u32 %v1671_v10, %v1669_v6  ;;  %v3061_v43 = vadd.s32 3, %v1694_v5  ;;  %v1698_v20 = vand.u32 3, %v1694_v5 }
 0x231   : > { %v1673_v14 = vclz %v3380_v29  ;;  %v3062_v39 = vand.u32 3, %v3061_v43  ;;  %vm1703_vm9 = vcmp.eq.s32.totalorder %v1698_v20, 2  ;;  %vm1700_vm11 = vcmp.eq.s32.totalorder %v1698_v20, 0 }
 0x232   : > { %vm1699_vm13 = vcmp.lt.s32.totalorder %v1698_v20, 2 }
 0x233   : > { %v3381_v1 = vadd.s32 4294967294, %v1673_v14  ;;  %vm3067_vm10 = vcmp.eq.s32.totalorder %v3062_v39, 2  ;;  %vm3064_vm12 = vcmp.eq.s32.totalorder %v3062_v39, 0  ;;  %vm3063_vm14 = vcmp.lt.s32.totalorder %v3062_v39, 2 }
 0x235   : > { %vm3382_vm15 = vcmp.lt.s32.totalorder %v3381_v1, 0 }
 0x236   : > { %v1676_v46 = vsel %vm3382_vm15, 0, %v3381_v1  ;;  %vm1697_vm15 = vweird.f32 %v4945_v51 }
 0x237   : > { %v1677_v9 = vsub.s32 32, %v1676_v46  ;;  %v1681_v17 = vsub.s32 4294967266, %v1676_v46  ;;  %v1678_v60 = vshll.u32 %v1669_v6, %v1676_v46 }
 0x238   : > { %v3612_v49 = vpop.eup %3611 }
 0x239   : > { %v3614_v24 = vpop.eup %3613  ;;  %v1807_v11 = vxor.u32 2147483648, %v3612_v49  ;;  %v1679_v35 = vshrl.u32 %v1661_v33, %v1677_v9  ;;  %v1682_v28 = vadd.s32 127, %v1681_v17 }
 0x23a   : > { %v1804_v0 = vxor.u32 2147483648, %v3614_v24 }
 0x23b   : > { %v1808_v30 = vsel %vm1806_vm1, %v1807_v11, %v3614_v24  ;;  %v3173_v58 = vsel %vm3171_vm0, %v1807_v11, %v3614_v24  ;;  %v1680_v32 = vor.u32 %v1679_v35, %v1678_v60  ;;  %v1683_v47 = vshll.u32 %v1682_v28, 23 }
 0x23c   : > { %v1805_v2 = vsel %vm1803_vm2, %v3612_v49, %v1804_v0  ;;  %v3170_v52 = vsel %vm3168_vm5, %v3612_v49, %v1804_v0 }
 0x23d   : > { %v1809_v27 = vsel %vm1802_vm3, %v1805_v2, %v1808_v30  ;;  %v3174_v26 = vsel %vm3167_vm4, %v3170_v52, %v3173_v58  ;;  %v1684_v54 = vor.u32 4788187, %v1683_v47  ;;  %v1687_v13 = vcvt.s32.f32 %v1680_v32 }
 0x23e   : > { %v1810_v62 = vsel %vm1800_vm6, nan, %v1809_v27  ;;  %v3175_v38 = vsel %vm1800_vm6, nan, %v3174_v26 }
 0x23f   : > { %1823 = vst [vmem:[%s4136_s7 + $0x60] sm:$0xff] %v1810_v62  ;;  %3188 = vst [vmem:[%s4141_s8 + $0x60] sm:$0xff] %v3175_v38  ;;  %v1685_v23 = vand.u32 2147483647, %v1684_v54 }
 0x241   : > { %v1688_v19 = vmul.f32 %v1687_v13, %v1685_v23 }
 0x243   : > { %v1689_v57 = vxor.u32 2147483648, %v1688_v19 }
 0x245   : > { %v1690_v36 = vsel %vm1607_vm7, %v1689_v57, %v1688_v19 }
 0x246   : > { %v1693_v61 = vsel %vm1606_vm8, %v4945_v51, %v1690_v36 }
 0x247   : > { %3615 = vcosq.f32 %v1693_v61 }
 0x248   : > { %3617 = vsinq.f32 %v1693_v61 }
 0x251   : > { %v3616_v45 = vpop.eup %3615 }
 0x252   : > { %v3618_v42 = vpop.eup %3617  ;;  %v1704_v15 = vxor.u32 2147483648, %v3616_v45  ;;  %3201 = sbr.rel (!%p3788_p5) target bundleno = 629 (0x275), region = 32 }
 0x253   : > { %v1701_v25 = vxor.u32 2147483648, %v3618_v42 }
 0x254   : > { %v1705_v59 = vsel %vm1703_vm9, %v1704_v15, %v3618_v42  ;;  %v3069_v16 = vsel %vm3067_vm10, %v1704_v15, %v3618_v42 }
 0x255   : > { %v1702_v63 = vsel %vm1700_vm11, %v3616_v45, %v1701_v25  ;;  %v3066_v4 = vsel %vm3064_vm12, %v3616_v45, %v1701_v25 }
 0x256   : > { %v1706_v21 = vsel %vm1699_vm13, %v1702_v63, %v1705_v59  ;;  %v3070_v34 = vsel %vm3063_vm14, %v3066_v4, %v3069_v16 }
 0x257   : > { %v1707_v22 = vsel %vm1697_vm15, nan, %v1706_v21  ;;  %v3071_v7 = vsel %vm1697_vm15, nan, %v3070_v34 }
 0x258   : > { %1822 = vst [vmem:[%s4136_s7 + $0x58] sm:$0xff] %v1707_v22  ;;  %3187 = vst [vmem:[%s4141_s8 + $0x58] sm:$0xff] %v3071_v7 }
 0x259   : > { %s5272_s11 = smov (!%p3204_p11, %s3203_s11), 13 }
 0x25a   : > { %s5137_s17 = sshll.u32 %s5272_s11, 7 }
 0x25b   : > { %s3208_s19 = ssub.s32 1664, %s5137_s17 }
 0x25c   : > { %3209 = vsyncadd %s3190_s9, %s3208_s19  ;;  %p3440_p12 = scmp.ne.s32.totalorder %s5137_s17, 0  ;;  %s3451_s20 = smul.u32 1664, %s3771_s16 }
 0x25d   : > { %s3214_s25 = sshll.u32 %s4136_s7, 4  ;;  %s3724_s30 = smov [#allocation2]   ;;  %s5150_s25 = int_to_ptr.vmem [resolvable:$true] %s3214_s25 }
 0x25e   : > { %s5148_s28 = scalar_lea.hbm %s5241_s2, %s3451_s20  ;;  %s3619_s29 = scalar_lea.vmem %s5150_s25, %s5137_s17 }
 0x25f   : > { %p3620_p13 = scmp.ne.s32.totalorder %s5150_s25, %s3619_s29  ;;  %s3623_s4 = sshll.u32 %s3724_s30, 4  ;;  %s3624_s4 = int_to_ptr.vmem [resolvable:$false] %s3623_s4 }
 0x260   : > { %s3625_s6 = scalar_lea.vmem %s3624_s4, 3328  ;;  %p3626_p2 = scmp.lt.s32.totalorder %s5150_s25, %s3624_s4 }
 0x261   : > { %p3621_p0 = pnand %p3620_p13, %p3440_p12  ;;  %p3627_p3 = scmp.lt.s32.totalorder %s3625_s6, %s3619_s29 }
 0x263   : > { %p3622_p1 = pneg %p3621_p0  ;;  %p3628_p4 = por %p3627_p3, %p3626_p2 }
 0x265   : > { %p3629_p7 = pnand %p3628_p4, %p3622_p1 }
 0x267   : > { %3632 = shalt.err (!%p3629_p7)
}
 0x268   : > { %s3633_s7 = scalar_lea.hbm %s5148_s28, %s5137_s17  ;;  %s3637_s20 = scalar_lea.hbm %s5241_s2, 3200 }
 0x269   : > { %p3634_p8 = scmp.ne.s32.totalorder %s5148_s28, %s3633_s7  ;;  %p3638_p11 = scmp.lt.u32.totalorder %s5148_s28, %s5241_s2 }
 0x26a   : > { %p3639_p13 = scmp.lt.u32.totalorder %s3637_s20, %s3633_s7  ;;  %p3641_p1 = scmp.lt.u32.totalorder %s3633_s7, %s5148_s28 }
 0x26b   : > { %p3635_p9 = pnand %p3634_p8, %p3440_p12 }
 0x26c   : > { %p3640_p0 = por %p3639_p13, %p3638_p11 }
 0x26d   : > { %p3636_p10 = pneg %p3635_p9 }
 0x26e   : > { %p3642_p2 = por %p3641_p1, %p3640_p0 }
 0x270   : > { %p3643_p3 = pnand %p3642_p2, %p3636_p10 }
 0x272   : > { %3646 = shalt.err (!%p3643_p3)
}
 0x273   : > { %s3725_s29 = smov 128   ;;  %s3726_s30 = smov 8  }
 0x274   : > { %3220 = dma.vmem_to_hbm [thread:$0]  (%p3440_p12), %s5150_s25, %s5137_s17, %s5148_s28, %s3190_s9, %s3725_s29, %s3725_s29, %s3726_s30  }
 0x275 PF: > { %3223 = sbr.rel (!%p3788_p5) target bundleno = 664 (0x298), region = 36  ;;  %s3225_s4 = ssub.s32 (%p3788_p5), 25, %s3799_s24 }
 0x276   : > { %p3226_p4 = scmp.lt.s32.totalorder (%p3788_p5), %s3225_s4, 13 }
 0x27c   : > { %s5274_s4 = smov (!%p3226_p4, %s3225_s4), 13 }
 0x27d   : > { %s5181_s6 = sshll.u32 %s5274_s4, 7 }
 0x27e   : > { %s3230_s7 = ssub.s32 1664, %s5181_s6 }
 0x27f   : > { %3231 = vsyncadd %s3195_s10, %s3230_s7  ;;  %p3445_p12 = scmp.ne.s32.totalorder %s5181_s6, 0  ;;  %s3452_s9 = smul.u32 1664, %s3771_s16 }
 0x280   : > { %s3236_s22 = sshll.u32 %s4141_s8, 4  ;;  %s3727_s11 = smov [#allocation4]   ;;  %s5194_s22 = int_to_ptr.vmem [resolvable:$true] %s3236_s22 }
 0x281   : > { %s5192_s24 = scalar_lea.hbm %s5242_s3, %s3452_s9  ;;  %s3647_s28 = scalar_lea.vmem %s5194_s22, %s5181_s6 }
 0x282   : > { %p3648_p5 = scmp.ne.s32.totalorder %s5194_s22, %s3647_s28  ;;  %s3651_s19 = sshll.u32 %s3727_s11, 4  ;;  %s3652_s19 = int_to_ptr.vmem [resolvable:$false] %s3651_s19 }
 0x283   : > { %s3653_s16 = scalar_lea.vmem %s3652_s19, 3328  ;;  %p3654_p9 = scmp.lt.s32.totalorder %s5194_s22, %s3652_s19 }
 0x284   : > { %p3649_p7 = pnand %p3648_p5, %p3445_p12  ;;  %p3655_p10 = scmp.lt.s32.totalorder %s3653_s16, %s3647_s28 }
 0x286   : > { %p3650_p8 = pneg %p3649_p7  ;;  %p3656_p11 = por %p3655_p10, %p3654_p9 }
 0x288   : > { %p3657_p13 = pnand %p3656_p11, %p3650_p8 }
 0x28a   : > { %3660 = shalt.err (!%p3657_p13)
}
 0x28b   : > { %s3661_s8 = scalar_lea.hbm %s5192_s24, %s5181_s6  ;;  %s3665_s27 = scalar_lea.hbm %s5242_s3, 3200 }
 0x28c   : > { %p3662_p0 = scmp.ne.s32.totalorder %s5192_s24, %s3661_s8  ;;  %p3666_p3 = scmp.lt.u32.totalorder %s5192_s24, %s5242_s3 }
 0x28d   : > { %p3667_p4 = scmp.lt.u32.totalorder %s3665_s27, %s3661_s8  ;;  %p3669_p7 = scmp.lt.u32.totalorder %s3661_s8, %s5192_s24 }
 0x28e   : > { %p3663_p1 = pnand %p3662_p0, %p3445_p12 }
 0x28f   : > { %p3668_p5 = por %p3667_p4, %p3666_p3 }
 0x290   : > { %p3664_p2 = pneg %p3663_p1 }
 0x291   : > { %p3670_p8 = por %p3669_p7, %p3668_p5 }
 0x293   : > { %p3671_p9 = pnand %p3670_p8, %p3664_p2 }
 0x295   : > { %3674 = shalt.err (!%p3671_p9)
}
 0x296   : > { %s3728_s4 = smov 128   ;;  %s3729_s7 = smov 8  }
 0x297   : > { %3242 = dma.vmem_to_hbm [thread:$0]  (%p3445_p12), %s5194_s22, %s5181_s6, %s5192_s24, %s3195_s10, %s3728_s4, %s3728_s4, %s3729_s7  }
 0x298 PF: > { %p3515_p10 = scmp.ge.s32.totalorder %s3713_s15, 2  ;;  %s3251_s9 = sand.u32 1, %s3701_s12  }
 0x299   : > { %s3252_s17 = scalar_lea.sflag [#allocation3], %s3251_s9 }
 0x29a   : > { %p3509_p11 = pnand %p3515_p10, %p3792_p6 }
 0x29c   : > { %3692 = dma.done.wait (!%p3509_p11), %s3252_s17, 1664  }
 0x29d   : > { %3694 = vsyncadd (!%p3509_p11), %s3252_s17, 4294965632  ;;  %s3261_s25 = scalar_lea.sflag [#allocation5], %s3251_s9 }
 0x29e   : > { %3696 = dma.done.wait (!%p3509_p11), %s3261_s25, 1664  }
 0x29f   : > { %3698 = vsyncadd (!%p3509_p11), %s3261_s25, 4294965632  ;;  %p17_p12 = scmp.ge.s32.totalorder %s3775_s18, 4   ;;  %s5267_s12 = smov %s3705_s13 }
 0x2a0   : > { %s5268_s13 = smov %s3709_s14  ;;  %s5269_s14 = smov %s3786_s21 }
 0x2a1   : > { %s5270_s15 = smov %s3775_s18  ;;  %19 = sbr.rel (!%p17_p12) target bundleno = 5 (0x5), region = 80 }
 0x2a8   :  { %3266 = vsyncpa [#allocation3], 1 }
 0x2a9   :  { %3268 = vsyncpa [#allocation3 + $0x1], 1 }
 0x2aa   :  { %3269 = vsyncpa [#allocation5], 1 }
 0x2ab   :  { %3271 = vsyncpa [#allocation5 + $0x1], 1 }

</bundles_post_ra>
